<compile_context>
chip_gen: v7x
topology: tpu7x:2x2x1
jax: 0.10.0
libtpu: 0.0.40
codegen_flags: <defaults>
</compile_context>

<pallas_src>
import functools

import numpy as np
import jax
import jax.numpy as jnp
from jax import lax
from jax.experimental import pallas as pl
from jax.experimental.pallas import tpu as pltpu


# ----------------------------------------------------------------------------
# Fused Pallas kernel: whole RCU block for B_tile samples per grid step
# ----------------------------------------------------------------------------
def _rcu_block_kernel(x_ref, w_ref, b_ref, out_ref, buf_ref, *,
                      H, WC, B_tile, num_blocks, num_stages):
    # x_ref   : (B_tile, H, WC)       lane-dense activations (WC = W*C)
    # w_ref   : (S, 3, WC, WC)        block-banded weights, S = blocks*stages
    # b_ref   : (num_blocks, 1, WC)   stage-0 bias, pre-tiled across W
    # out_ref : (B_tile, H, WC)
    # buf_ref : (H + 2, WC) VMEM scratch: activation + 1-row zero halo
    zero_row = jnp.zeros((1, WC), jnp.float32)
    # Re-zero only the 2 halo rows, every grid step (cheap, and robust when the
    # "parallel" grid axis is sharded across cores so program_id(0)==0 tricks
    # would not run on every core).  The interior is rewritten every stage.
    buf_ref[0:1, :] = zero_row
    buf_ref[H + 1:H + 2, :] = zero_row

    for b in range(B_tile):
        cur = x_ref[b]                                   # (H, WC), f32
        s = 0
        for i in range(num_blocks):
            # Stage-0 ReLU.  In the PyTorch module this ReLU is in-place and
            # aliases `residual`, so the residual is the ReLU'd block input.
            cur = jnp.maximum(cur, 0.0)
            residual = cur
            for j in range(num_stages):
                if j > 0:
                    cur = jnp.maximum(cur, 0.0)
                # One lane-dense (H, 128) store into the halo buffer.
                buf_ref[1:H + 1, :] = cur
                # 3x3 conv == 3 lane-dense matmuls against the banded weights.
                acc = jnp.dot(buf_ref[0:H, :], w_ref[s, 0],
                              preferred_element_type=jnp.float32)
                for kh in (1, 2):
                    acc = acc + jnp.dot(buf_ref[kh:kh + H, :], w_ref[s, kh],
                                        preferred_element_type=jnp.float32)
                if j == 0:                               # bias only on stage 0
                    acc = acc + b_ref[i]
                cur = acc
                s += 1
            cur = cur + residual
        out_ref[b] = cur.astype(out_ref.dtype)


# ----------------------------------------------------------------------------
# Host-side packing: HWIO conv weights -> block-banded (3, W*C, W*C) matrices
# ----------------------------------------------------------------------------
def _pack_params(params, num_blocks, num_stages, W, C):
    WC = W * C
    ws, bs = [], []
    for i in range(num_blocks):
        for j in range(num_stages):
            w, b = params[(i, j)]
            # The residual add requires in_planes == out_planes (same as the
            # PyTorch module needs for `x + residual` to type-check).
            assert w.shape == (3, 3, C, C), (
                "RCU fused kernel requires in_planes == out_planes")
            w_np = np.asarray(w, np.float32)             # (kh, kw, ci, co)
            big = np.zeros((3, WC, WC), np.float32)
            for kh in range(3):
                for kw in range(3):
                    for col in range(W):                 # output column
                        src = col + kw - 1               # input column (pad=1)
                        if 0 <= src < W:                 # out-of-range == zero pad
                            big[kh, src * C:(src + 1) * C,
                                    col * C:(col + 1) * C] = w_np[kh, kw]
            ws.append(big)
            if j == 0:
                # (1, C) bias -> (1, W*C), so lane w*C + ci carries bias[ci].
                bs.append(np.tile(np.asarray(b, np.float32), (1, W)))
    w_packed = jnp.asarray(np.stack(ws, axis=0))         # (S, 3, WC, WC)
    b_packed = jnp.asarray(np.stack(bs, axis=0))         # (num_blocks, 1, WC)
    return w_packed, b_packed


# ----------------------------------------------------------------------------
# RCUBlock forward: all parallel branches + batch in one pallas_call
# ----------------------------------------------------------------------------
def rcu_block_forward(x_list, params, num_blocks, num_stages):
    P = len(x_list)                                      # num_parallel branches
    N, H, W, C = x_list[0].shape                         # NHWC
    WC = W * C
    S = num_blocks * num_stages
    total = P * N

    w_packed, b_packed = _pack_params(params, num_blocks, num_stages, W, C)

    # Fuse (W, C) into the minor (lane) axis: (total, H, W*C).
    x = jnp.stack(x_list, axis=0).reshape(total, H, WC).astype(jnp.float32)

    # Samples per grid step: amortize the per-step overhead but keep >= 2 grid
    # steps so the "parallel" axis can be split across v7x's 2 TensorCores.
    B_tile = 2 if (total % 2 == 0 and total >= 4) else 1
    grid = (total // B_tile,)

    kernel = functools.partial(_rcu_block_kernel, H=H, WC=WC, B_tile=B_tile,
                               num_blocks=num_blocks, num_stages=num_stages)

    out = pl.pallas_call(
        kernel,
        out_shape=jax.ShapeDtypeStruct((total, H, WC), jnp.float32),
        grid_spec=pltpu.PrefetchScalarGridSpec(
            num_scalar_prefetch=0,
            grid=grid,
            in_specs=[
                # B_tile samples per grid step, lane-dense rows.
                pl.BlockSpec((B_tile, H, WC), lambda g: (g, 0, 0)),
                # Shared weights / biases: constant block index -> resident in
                # VMEM, DMA'd only once.
                pl.BlockSpec((S, 3, WC, WC), lambda g: (0, 0, 0, 0)),
                pl.BlockSpec((num_blocks, 1, WC), lambda g: (0, 0, 0)),
            ],
            out_specs=pl.BlockSpec((B_tile, H, WC), lambda g: (g, 0, 0)),
            scratch_shapes=[
                pltpu.VMEM((H + 2, WC), jnp.float32),     # halo-padded activation
            ],
        ),
        compiler_params=pltpu.CompilerParams(
            dimension_semantics=("parallel",),            # shard across TCs (v7x)
            vmem_limit_bytes=32 * 1024 * 1024,            # fits all generations
        ),
    )(x, w_packed, b_packed)

    out = out.reshape(P, N, H, W, C)
    return [out[p] for p in range(P)]


# ----------------------------------------------------------------------------
# Deterministic parameter init (matches the module's Conv2d shapes; bias only
# on stage j == 0 of each block, exactly as `bias=j == 0` in the module)
# ----------------------------------------------------------------------------
def init_rcu_params(key, in_planes, out_planes, num_blocks, num_stages):
    params = {}
    for i in range(num_blocks):
        for j in range(num_stages):
            cin = in_planes if (i == 0 and j == 0) else out_planes
            key, wk, bk = jax.random.split(key, 3)
            fan_in = cin * 9
            bound = 1.0 / (fan_in ** 0.5)
            # HWIO layout (PyTorch stores OIHW; the math is identical).
            w = jax.random.uniform(wk, (3, 3, cin, out_planes),
                                   jnp.float32, -bound, bound)
            b = (jax.random.uniform(bk, (1, out_planes),
                                    jnp.float32, -bound, bound)
                 if j == 0 else None)
            params[(i, j)] = (w, b)
    return params


# ----------------------------------------------------------------------------
# Pure-JAX reference (lax.conv), reproducing the module's in-place-ReLU
# aliasing: the residual is the ReLU'd block input.
# ----------------------------------------------------------------------------
def rcu_block_reference(x_list, params, num_blocks, num_stages):
    def conv(x, w, b):
        y = lax.conv_general_dilated(
            x, w, window_strides=(1, 1), padding=((1, 1), (1, 1)),
            dimension_numbers=("NHWC", "HWIO", "NHWC"))
        if b is not None:
            y = y + b.reshape(1, 1, 1, -1)
        return y

    outs = []
    for x in x_list:
        xb = x
        for i in range(num_blocks):
            xb = jax.nn.relu(xb)          # in-place ReLU aliases the residual
            residual = xb
            for j in range(num_stages):
                if j > 0:
                    xb = jax.nn.relu(xb)
                w, b = params[(i, j)]
                xb = conv(xb, w, b)
            xb = xb + residual
        outs.append(xb)
    return outs


if __name__ == "__main__":
    # RCUBlock(in_planes=8, out_planes=8, num_blocks=2, num_stages=2,
    #          num_parallel=2); H=W=16 so W*C = 128 (one full lane width).
    N, C, Hdim, Wdim = 2, 8, 16, 16
    num_blocks, num_stages, num_parallel = 2, 2, 2

    key = jax.random.PRNGKey(0)
    key, *xkeys = jax.random.split(key, num_parallel + 1)
    # Inputs built in PyTorch NCHW convention, then transposed to NHWC.
    x_nchw = [jax.random.normal(k, (N, C, Hdim, Wdim), jnp.float32)
              for k in xkeys]
    x_nhwc = [jnp.transpose(x, (0, 2, 3, 1)) for x in x_nchw]

    params = init_rcu_params(key, C, C, num_blocks, num_stages)

    out = rcu_block_forward(x_nhwc, params, num_blocks, num_stages)
    out = [jax.block_until_ready(o) for o in out]

    ref = rcu_block_reference(x_nhwc, params, num_blocks, num_stages)
    for o, r in zip(out, ref):
        assert o.shape == r.shape
        err = float(jnp.max(jnp.abs(o - r)))
        assert err < 1e-3, err

    print("KERNEL_OK")
</pallas_src>

<mosaic_0001>
module attributes {stable_mosaic.version = 11 : i64} {
  func.func @_rcu_block_kernel(%arg0: i32, %arg1: memref<2x16x128xf32, #tpu.memory_space<vmem>>, %arg2: memref<4x3x128x128xf32, #tpu.memory_space<vmem>>, %arg3: memref<2x1x128xf32, #tpu.memory_space<vmem>>, %arg4: memref<2x16x128xf32, #tpu.memory_space<vmem>>, %arg5: memref<18x128xf32, #tpu.memory_space<vmem>>) attributes {dimension_semantics = [#tpu.dimension_semantics<parallel>], iteration_bounds = array<i64: 2>, scalar_prefetch = 0 : i64, scratch_operands = 1 : i64, tpu.core_type = #tpu.core_type<tc>, window_params = [{transform_indices = @transform_0, window_bounds = array<i64: 2, 16, 128>}, {pipeline_mode = #tpu.pipeline_mode<synchronous>, transform_indices = @transform_1, window_bounds = array<i64: 4, 3, 128, 128>}, {pipeline_mode = #tpu.pipeline_mode<synchronous>, transform_indices = @transform_2, window_bounds = array<i64: 2, 1, 128>}, {transform_indices = @transform_3, window_bounds = array<i64: 2, 16, 128>}]} {
    %cst = arith.constant 0.000000e+00 : f32
    %0 = vector.broadcast %cst : f32 to vector<1x128xf32>
    %c0 = arith.constant 0 : index
    %c0_0 = arith.constant 0 : index
    %1 = vector.load %arg5[%c0, %c0_0] : memref<18x128xf32, #tpu.memory_space<vmem>>, vector<1x128xf32>
    tpu.vector_store %arg5[%c0, %c0_0], %0 {strides = array<i32>} : memref<18x128xf32, #tpu.memory_space<vmem>>, vector<1x128xf32>,
    %c17 = arith.constant 17 : index
    %c0_1 = arith.constant 0 : index
    %2 = vector.load %arg5[%c17, %c0_1] : memref<18x128xf32, #tpu.memory_space<vmem>>, vector<1x128xf32>
    tpu.vector_store %arg5[%c17, %c0_1], %0 {strides = array<i32>} : memref<18x128xf32, #tpu.memory_space<vmem>>, vector<1x128xf32>,
    %c0_2 = arith.constant 0 : index
    %c0_3 = arith.constant 0 : index
    %c0_4 = arith.constant 0 : index
    %3 = vector.load %arg1[%c0_2, %c0_3, %c0_4] : memref<2x16x128xf32, #tpu.memory_space<vmem>>, vector<1x16x128xf32>
    %4 = vector.shape_cast %3 : vector<1x16x128xf32> to vector<16x128xf32>
    %cst_5 = arith.constant 0.000000e+00 : f32
    %5 = vector.broadcast %cst_5 : f32 to vector<16x128xf32>
    %6 = arith.maximumf %4, %5 : vector<16x128xf32>
    %c1 = arith.constant 1 : index
    %c0_6 = arith.constant 0 : index
    %7 = vector.load %arg5[%c1, %c0_6] : memref<18x128xf32, #tpu.memory_space<vmem>>, vector<16x128xf32>
    tpu.vector_store %arg5[%c1, %c0_6], %6 {strides = array<i32>} : memref<18x128xf32, #tpu.memory_space<vmem>>, vector<16x128xf32>,
    %c0_7 = arith.constant 0 : index
    %c0_8 = arith.constant 0 : index
    %8 = vector.load %arg5[%c0_7, %c0_8] : memref<18x128xf32, #tpu.memory_space<vmem>>, vector<16x128xf32>
    %c0_9 = arith.constant 0 : index
    %c0_10 = arith.constant 0 : index
    %c0_11 = arith.constant 0 : index
    %c0_12 = arith.constant 0 : index
    %9 = vector.load %arg2[%c0_9, %c0_10, %c0_11, %c0_12] : memref<4x3x128x128xf32, #tpu.memory_space<vmem>>, vector<1x1x128x128xf32>
    %10 = vector.shape_cast %9 : vector<1x1x128x128xf32> to vector<128x128xf32>
    %cst_13 = arith.constant dense<0.000000e+00> : vector<16x128xf32>
    %11 = tpu.matmul %8, %10, %cst_13 {dimension_numbers = #tpu.dot_dimension_numbers<[1], [0], [0], [1], [0, 0, 1, 1], [], []>} : vector<16x128xf32>, vector<128x128xf32>, vector<16x128xf32> -> vector<16x128xf32>
    %c1_14 = arith.constant 1 : index
    %c0_15 = arith.constant 0 : index
    %12 = vector.load %arg5[%c1_14, %c0_15] : memref<18x128xf32, #tpu.memory_space<vmem>>, vector<16x128xf32>
    %c0_16 = arith.constant 0 : index
    %c1_17 = arith.constant 1 : index
    %c0_18 = arith.constant 0 : index
    %c0_19 = arith.constant 0 : index
    %13 = vector.load %arg2[%c0_16, %c1_17, %c0_18, %c0_19] : memref<4x3x128x128xf32, #tpu.memory_space<vmem>>, vector<1x1x128x128xf32>
    %14 = vector.shape_cast %13 : vector<1x1x128x128xf32> to vector<128x128xf32>
    %cst_20 = arith.constant dense<0.000000e+00> : vector<16x128xf32>
    %15 = tpu.matmul %12, %14, %cst_20 {dimension_numbers = #tpu.dot_dimension_numbers<[1], [0], [0], [1], [0, 0, 1, 1], [], []>} : vector<16x128xf32>, vector<128x128xf32>, vector<16x128xf32> -> vector<16x128xf32>
    %16 = arith.addf %11, %15 : vector<16x128xf32>
    %c2 = arith.constant 2 : index
    %c0_21 = arith.constant 0 : index
    %17 = vector.load %arg5[%c2, %c0_21] : memref<18x128xf32, #tpu.memory_space<vmem>>, vector<16x128xf32>
    %c0_22 = arith.constant 0 : index
    %c2_23 = arith.constant 2 : index
    %c0_24 = arith.constant 0 : index
    %c0_25 = arith.constant 0 : index
    %18 = vector.load %arg2[%c0_22, %c2_23, %c0_24, %c0_25] : memref<4x3x128x128xf32, #tpu.memory_space<vmem>>, vector<1x1x128x128xf32>
    %19 = vector.shape_cast %18 : vector<1x1x128x128xf32> to vector<128x128xf32>
    %cst_26 = arith.constant dense<0.000000e+00> : vector<16x128xf32>
    %20 = tpu.matmul %17, %19, %cst_26 {dimension_numbers = #tpu.dot_dimension_numbers<[1], [0], [0], [1], [0, 0, 1, 1], [], []>} : vector<16x128xf32>, vector<128x128xf32>, vector<16x128xf32> -> vector<16x128xf32>
    %21 = arith.addf %16, %20 : vector<16x128xf32>
    %c0_27 = arith.constant 0 : index
    %c0_28 = arith.constant 0 : index
    %c0_29 = arith.constant 0 : index
    %22 = vector.load %arg3[%c0_27, %c0_28, %c0_29] : memref<2x1x128xf32, #tpu.memory_space<vmem>>, vector<1x1x128xf32>
    %23 = vector.shape_cast %22 : vector<1x1x128xf32> to vector<1x128xf32>
    %24 = vector.broadcast %23 : vector<1x128xf32> to vector<16x128xf32>
    %25 = arith.addf %21, %24 : vector<16x128xf32>
    %cst_30 = arith.constant 0.000000e+00 : f32
    %26 = vector.broadcast %cst_30 : f32 to vector<16x128xf32>
    %27 = arith.maximumf %25, %26 : vector<16x128xf32>
    %c1_31 = arith.constant 1 : index
    %c0_32 = arith.constant 0 : index
    %28 = vector.load %arg5[%c1_31, %c0_32] : memref<18x128xf32, #tpu.memory_space<vmem>>, vector<16x128xf32>
    tpu.vector_store %arg5[%c1_31, %c0_32], %27 {strides = array<i32>} : memref<18x128xf32, #tpu.memory_space<vmem>>, vector<16x128xf32>,
    %c0_33 = arith.constant 0 : index
    %c0_34 = arith.constant 0 : index
    %29 = vector.load %arg5[%c0_33, %c0_34] : memref<18x128xf32, #tpu.memory_space<vmem>>, vector<16x128xf32>
    %c1_35 = arith.constant 1 : index
    %c0_36 = arith.constant 0 : index
    %c0_37 = arith.constant 0 : index
    %c0_38 = arith.constant 0 : index
    %30 = vector.load %arg2[%c1_35, %c0_36, %c0_37, %c0_38] : memref<4x3x128x128xf32, #tpu.memory_space<vmem>>, vector<1x1x128x128xf32>
    %31 = vector.shape_cast %30 : vector<1x1x128x128xf32> to vector<128x128xf32>
    %cst_39 = arith.constant dense<0.000000e+00> : vector<16x128xf32>
    %32 = tpu.matmul %29, %31, %cst_39 {dimension_numbers = #tpu.dot_dimension_numbers<[1], [0], [0], [1], [0, 0, 1, 1], [], []>} : vector<16x128xf32>, vector<128x128xf32>, vector<16x128xf32> -> vector<16x128xf32>
    %c1_40 = arith.constant 1 : index
    %c0_41 = arith.constant 0 : index
    %33 = vector.load %arg5[%c1_40, %c0_41] : memref<18x128xf32, #tpu.memory_space<vmem>>, vector<16x128xf32>
    %c1_42 = arith.constant 1 : index
    %c1_43 = arith.constant 1 : index
    %c0_44 = arith.constant 0 : index
    %c0_45 = arith.constant 0 : index
    %34 = vector.load %arg2[%c1_42, %c1_43, %c0_44, %c0_45] : memref<4x3x128x128xf32, #tpu.memory_space<vmem>>, vector<1x1x128x128xf32>
    %35 = vector.shape_cast %34 : vector<1x1x128x128xf32> to vector<128x128xf32>
    %cst_46 = arith.constant dense<0.000000e+00> : vector<16x128xf32>
    %36 = tpu.matmul %33, %35, %cst_46 {dimension_numbers = #tpu.dot_dimension_numbers<[1], [0], [0], [1], [0, 0, 1, 1], [], []>} : vector<16x128xf32>, vector<128x128xf32>, vector<16x128xf32> -> vector<16x128xf32>
    %37 = arith.addf %32, %36 : vector<16x128xf32>
    %c2_47 = arith.constant 2 : index
    %c0_48 = arith.constant 0 : index
    %38 = vector.load %arg5[%c2_47, %c0_48] : memref<18x128xf32, #tpu.memory_space<vmem>>, vector<16x128xf32>
    %c1_49 = arith.constant 1 : index
    %c2_50 = arith.constant 2 : index
    %c0_51 = arith.constant 0 : index
    %c0_52 = arith.constant 0 : index
    %39 = vector.load %arg2[%c1_49, %c2_50, %c0_51, %c0_52] : memref<4x3x128x128xf32, #tpu.memory_space<vmem>>, vector<1x1x128x128xf32>
    %40 = vector.shape_cast %39 : vector<1x1x128x128xf32> to vector<128x128xf32>
    %cst_53 = arith.constant dense<0.000000e+00> : vector<16x128xf32>
    %41 = tpu.matmul %38, %40, %cst_53 {dimension_numbers = #tpu.dot_dimension_numbers<[1], [0], [0], [1], [0, 0, 1, 1], [], []>} : vector<16x128xf32>, vector<128x128xf32>, vector<16x128xf32> -> vector<16x128xf32>
    %42 = arith.addf %37, %41 : vector<16x128xf32>
    %43 = arith.addf %42, %6 : vector<16x128xf32>
    %cst_54 = arith.constant 0.000000e+00 : f32
    %44 = vector.broadcast %cst_54 : f32 to vector<16x128xf32>
    %45 = arith.maximumf %43, %44 : vector<16x128xf32>
    %c1_55 = arith.constant 1 : index
    %c0_56 = arith.constant 0 : index
    %46 = vector.load %arg5[%c1_55, %c0_56] : memref<18x128xf32, #tpu.memory_space<vmem>>, vector<16x128xf32>
    tpu.vector_store %arg5[%c1_55, %c0_56], %45 {strides = array<i32>} : memref<18x128xf32, #tpu.memory_space<vmem>>, vector<16x128xf32>,
    %c0_57 = arith.constant 0 : index
    %c0_58 = arith.constant 0 : index
    %47 = vector.load %arg5[%c0_57, %c0_58] : memref<18x128xf32, #tpu.memory_space<vmem>>, vector<16x128xf32>
    %c2_59 = arith.constant 2 : index
    %c0_60 = arith.constant 0 : index
    %c0_61 = arith.constant 0 : index
    %c0_62 = arith.constant 0 : index
    %48 = vector.load %arg2[%c2_59, %c0_60, %c0_61, %c0_62] : memref<4x3x128x128xf32, #tpu.memory_space<vmem>>, vector<1x1x128x128xf32>
    %49 = vector.shape_cast %48 : vector<1x1x128x128xf32> to vector<128x128xf32>
    %cst_63 = arith.constant dense<0.000000e+00> : vector<16x128xf32>
    %50 = tpu.matmul %47, %49, %cst_63 {dimension_numbers = #tpu.dot_dimension_numbers<[1], [0], [0], [1], [0, 0, 1, 1], [], []>} : vector<16x128xf32>, vector<128x128xf32>, vector<16x128xf32> -> vector<16x128xf32>
    %c1_64 = arith.constant 1 : index
    %c0_65 = arith.constant 0 : index
    %51 = vector.load %arg5[%c1_64, %c0_65] : memref<18x128xf32, #tpu.memory_space<vmem>>, vector<16x128xf32>
    %c2_66 = arith.constant 2 : index
    %c1_67 = arith.constant 1 : index
    %c0_68 = arith.constant 0 : index
    %c0_69 = arith.constant 0 : index
    %52 = vector.load %arg2[%c2_66, %c1_67, %c0_68, %c0_69] : memref<4x3x128x128xf32, #tpu.memory_space<vmem>>, vector<1x1x128x128xf32>
    %53 = vector.shape_cast %52 : vector<1x1x128x128xf32> to vector<128x128xf32>
    %cst_70 = arith.constant dense<0.000000e+00> : vector<16x128xf32>
    %54 = tpu.matmul %51, %53, %cst_70 {dimension_numbers = #tpu.dot_dimension_numbers<[1], [0], [0], [1], [0, 0, 1, 1], [], []>} : vector<16x128xf32>, vector<128x128xf32>, vector<16x128xf32> -> vector<16x128xf32>
    %55 = arith.addf %50, %54 : vector<16x128xf32>
    %c2_71 = arith.constant 2 : index
    %c0_72 = arith.constant 0 : index
    %56 = vector.load %arg5[%c2_71, %c0_72] : memref<18x128xf32, #tpu.memory_space<vmem>>, vector<16x128xf32>
    %c2_73 = arith.constant 2 : index
    %c2_74 = arith.constant 2 : index
    %c0_75 = arith.constant 0 : index
    %c0_76 = arith.constant 0 : index
    %57 = vector.load %arg2[%c2_73, %c2_74, %c0_75, %c0_76] : memref<4x3x128x128xf32, #tpu.memory_space<vmem>>, vector<1x1x128x128xf32>
    %58 = vector.shape_cast %57 : vector<1x1x128x128xf32> to vector<128x128xf32>
    %cst_77 = arith.constant dense<0.000000e+00> : vector<16x128xf32>
    %59 = tpu.matmul %56, %58, %cst_77 {dimension_numbers = #tpu.dot_dimension_numbers<[1], [0], [0], [1], [0, 0, 1, 1], [], []>} : vector<16x128xf32>, vector<128x128xf32>, vector<16x128xf32> -> vector<16x128xf32>
    %60 = arith.addf %55, %59 : vector<16x128xf32>
    %c1_78 = arith.constant 1 : index
    %c0_79 = arith.constant 0 : index
    %c0_80 = arith.constant 0 : index
    %61 = vector.load %arg3[%c1_78, %c0_79, %c0_80] : memref<2x1x128xf32, #tpu.memory_space<vmem>>, vector<1x1x128xf32>
    %62 = vector.shape_cast %61 : vector<1x1x128xf32> to vector<1x128xf32>
    %63 = vector.broadcast %62 : vector<1x128xf32> to vector<16x128xf32>
    %64 = arith.addf %60, %63 : vector<16x128xf32>
    %cst_81 = arith.constant 0.000000e+00 : f32
    %65 = vector.broadcast %cst_81 : f32 to vector<16x128xf32>
    %66 = arith.maximumf %64, %65 : vector<16x128xf32>
    %c1_82 = arith.constant 1 : index
    %c0_83 = arith.constant 0 : index
    %67 = vector.load %arg5[%c1_82, %c0_83] : memref<18x128xf32, #tpu.memory_space<vmem>>, vector<16x128xf32>
    tpu.vector_store %arg5[%c1_82, %c0_83], %66 {strides = array<i32>} : memref<18x128xf32, #tpu.memory_space<vmem>>, vector<16x128xf32>,
    %c0_84 = arith.constant 0 : index
    %c0_85 = arith.constant 0 : index
    %68 = vector.load %arg5[%c0_84, %c0_85] : memref<18x128xf32, #tpu.memory_space<vmem>>, vector<16x128xf32>
    %c3 = arith.constant 3 : index
    %c0_86 = arith.constant 0 : index
    %c0_87 = arith.constant 0 : index
    %c0_88 = arith.constant 0 : index
    %69 = vector.load %arg2[%c3, %c0_86, %c0_87, %c0_88] : memref<4x3x128x128xf32, #tpu.memory_space<vmem>>, vector<1x1x128x128xf32>
    %70 = vector.shape_cast %69 : vector<1x1x128x128xf32> to vector<128x128xf32>
    %cst_89 = arith.constant dense<0.000000e+00> : vector<16x128xf32>
    %71 = tpu.matmul %68, %70, %cst_89 {dimension_numbers = #tpu.dot_dimension_numbers<[1], [0], [0], [1], [0, 0, 1, 1], [], []>} : vector<16x128xf32>, vector<128x128xf32>, vector<16x128xf32> -> vector<16x128xf32>
    %c1_90 = arith.constant 1 : index
    %c0_91 = arith.constant 0 : index
    %72 = vector.load %arg5[%c1_90, %c0_91] : memref<18x128xf32, #tpu.memory_space<vmem>>, vector<16x128xf32>
    %c3_92 = arith.constant 3 : index
    %c1_93 = arith.constant 1 : index
    %c0_94 = arith.constant 0 : index
    %c0_95 = arith.constant 0 : index
    %73 = vector.load %arg2[%c3_92, %c1_93, %c0_94, %c0_95] : memref<4x3x128x128xf32, #tpu.memory_space<vmem>>, vector<1x1x128x128xf32>
    %74 = vector.shape_cast %73 : vector<1x1x128x128xf32> to vector<128x128xf32>
    %cst_96 = arith.constant dense<0.000000e+00> : vector<16x128xf32>
    %75 = tpu.matmul %72, %74, %cst_96 {dimension_numbers = #tpu.dot_dimension_numbers<[1], [0], [0], [1], [0, 0, 1, 1], [], []>} : vector<16x128xf32>, vector<128x128xf32>, vector<16x128xf32> -> vector<16x128xf32>
    %76 = arith.addf %71, %75 : vector<16x128xf32>
    %c2_97 = arith.constant 2 : index
    %c0_98 = arith.constant 0 : index
    %77 = vector.load %arg5[%c2_97, %c0_98] : memref<18x128xf32, #tpu.memory_space<vmem>>, vector<16x128xf32>
    %c3_99 = arith.constant 3 : index
    %c2_100 = arith.constant 2 : index
    %c0_101 = arith.constant 0 : index
    %c0_102 = arith.constant 0 : index
    %78 = vector.load %arg2[%c3_99, %c2_100, %c0_101, %c0_102] : memref<4x3x128x128xf32, #tpu.memory_space<vmem>>, vector<1x1x128x128xf32>
    %79 = vector.shape_cast %78 : vector<1x1x128x128xf32> to vector<128x128xf32>
    %cst_103 = arith.constant dense<0.000000e+00> : vector<16x128xf32>
    %80 = tpu.matmul %77, %79, %cst_103 {dimension_numbers = #tpu.dot_dimension_numbers<[1], [0], [0], [1], [0, 0, 1, 1], [], []>} : vector<16x128xf32>, vector<128x128xf32>, vector<16x128xf32> -> vector<16x128xf32>
    %81 = arith.addf %76, %80 : vector<16x128xf32>
    %82 = arith.addf %81, %45 : vector<16x128xf32>
    %c0_104 = arith.constant 0 : index
    %c0_105 = arith.constant 0 : index
    %c0_106 = arith.constant 0 : index
    %83 = vector.load %arg4[%c0_104, %c0_105, %c0_106] : memref<2x16x128xf32, #tpu.memory_space<vmem>>, vector<1x16x128xf32>
    %84 = vector.shape_cast %83 : vector<1x16x128xf32> to vector<16x128xf32>
    %85 = vector.shape_cast %82 : vector<16x128xf32> to vector<1x16x128xf32>
    tpu.vector_store %arg4[%c0_104, %c0_105, %c0_106], %85 {strides = array<i32>} : memref<2x16x128xf32, #tpu.memory_space<vmem>>, vector<1x16x128xf32>,
    %c1_107 = arith.constant 1 : index
    %c0_108 = arith.constant 0 : index
    %c0_109 = arith.constant 0 : index
    %86 = vector.load %arg1[%c1_107, %c0_108, %c0_109] : memref<2x16x128xf32, #tpu.memory_space<vmem>>, vector<1x16x128xf32>
    %87 = vector.shape_cast %86 : vector<1x16x128xf32> to vector<16x128xf32>
    %cst_110 = arith.constant 0.000000e+00 : f32
    %88 = vector.broadcast %cst_110 : f32 to vector<16x128xf32>
    %89 = arith.maximumf %87, %88 : vector<16x128xf32>
    %c1_111 = arith.constant 1 : index
    %c0_112 = arith.constant 0 : index
    %90 = vector.load %arg5[%c1_111, %c0_112] : memref<18x128xf32, #tpu.memory_space<vmem>>, vector<16x128xf32>
    tpu.vector_store %arg5[%c1_111, %c0_112], %89 {strides = array<i32>} : memref<18x128xf32, #tpu.memory_space<vmem>>, vector<16x128xf32>,
    %c0_113 = arith.constant 0 : index
    %c0_114 = arith.constant 0 : index
    %91 = vector.load %arg5[%c0_113, %c0_114] : memref<18x128xf32, #tpu.memory_space<vmem>>, vector<16x128xf32>
    %c0_115 = arith.constant 0 : index
    %c0_116 = arith.constant 0 : index
    %c0_117 = arith.constant 0 : index
    %c0_118 = arith.constant 0 : index
    %92 = vector.load %arg2[%c0_115, %c0_116, %c0_117, %c0_118] : memref<4x3x128x128xf32, #tpu.memory_space<vmem>>, vector<1x1x128x128xf32>
    %93 = vector.shape_cast %92 : vector<1x1x128x128xf32> to vector<128x128xf32>
    %cst_119 = arith.constant dense<0.000000e+00> : vector<16x128xf32>
    %94 = tpu.matmul %91, %93, %cst_119 {dimension_numbers = #tpu.dot_dimension_numbers<[1], [0], [0], [1], [0, 0, 1, 1], [], []>} : vector<16x128xf32>, vector<128x128xf32>, vector<16x128xf32> -> vector<16x128xf32>
    %c1_120 = arith.constant 1 : index
    %c0_121 = arith.constant 0 : index
    %95 = vector.load %arg5[%c1_120, %c0_121] : memref<18x128xf32, #tpu.memory_space<vmem>>, vector<16x128xf32>
    %c0_122 = arith.constant 0 : index
    %c1_123 = arith.constant 1 : index
    %c0_124 = arith.constant 0 : index
    %c0_125 = arith.constant 0 : index
    %96 = vector.load %arg2[%c0_122, %c1_123, %c0_124, %c0_125] : memref<4x3x128x128xf32, #tpu.memory_space<vmem>>, vector<1x1x128x128xf32>
    %97 = vector.shape_cast %96 : vector<1x1x128x128xf32> to vector<128x128xf32>
    %cst_126 = arith.constant dense<0.000000e+00> : vector<16x128xf32>
    %98 = tpu.matmul %95, %97, %cst_126 {dimension_numbers = #tpu.dot_dimension_numbers<[1], [0], [0], [1], [0, 0, 1, 1], [], []>} : vector<16x128xf32>, vector<128x128xf32>, vector<16x128xf32> -> vector<16x128xf32>
    %99 = arith.addf %94, %98 : vector<16x128xf32>
    %c2_127 = arith.constant 2 : index
    %c0_128 = arith.constant 0 : index
    %100 = vector.load %arg5[%c2_127, %c0_128] : memref<18x128xf32, #tpu.memory_space<vmem>>, vector<16x128xf32>
    %c0_129 = arith.constant 0 : index
    %c2_130 = arith.constant 2 : index
    %c0_131 = arith.constant 0 : index
    %c0_132 = arith.constant 0 : index
    %101 = vector.load %arg2[%c0_129, %c2_130, %c0_131, %c0_132] : memref<4x3x128x128xf32, #tpu.memory_space<vmem>>, vector<1x1x128x128xf32>
    %102 = vector.shape_cast %101 : vector<1x1x128x128xf32> to vector<128x128xf32>
    %cst_133 = arith.constant dense<0.000000e+00> : vector<16x128xf32>
    %103 = tpu.matmul %100, %102, %cst_133 {dimension_numbers = #tpu.dot_dimension_numbers<[1], [0], [0], [1], [0, 0, 1, 1], [], []>} : vector<16x128xf32>, vector<128x128xf32>, vector<16x128xf32> -> vector<16x128xf32>
    %104 = arith.addf %99, %103 : vector<16x128xf32>
    %c0_134 = arith.constant 0 : index
    %c0_135 = arith.constant 0 : index
    %c0_136 = arith.constant 0 : index
    %105 = vector.load %arg3[%c0_134, %c0_135, %c0_136] : memref<2x1x128xf32, #tpu.memory_space<vmem>>, vector<1x1x128xf32>
    %106 = vector.shape_cast %105 : vector<1x1x128xf32> to vector<1x128xf32>
    %107 = vector.broadcast %106 : vector<1x128xf32> to vector<16x128xf32>
    %108 = arith.addf %104, %107 : vector<16x128xf32>
    %cst_137 = arith.constant 0.000000e+00 : f32
    %109 = vector.broadcast %cst_137 : f32 to vector<16x128xf32>
    %110 = arith.maximumf %108, %109 : vector<16x128xf32>
    %c1_138 = arith.constant 1 : index
    %c0_139 = arith.constant 0 : index
    %111 = vector.load %arg5[%c1_138, %c0_139] : memref<18x128xf32, #tpu.memory_space<vmem>>, vector<16x128xf32>
    tpu.vector_store %arg5[%c1_138, %c0_139], %110 {strides = array<i32>} : memref<18x128xf32, #tpu.memory_space<vmem>>, vector<16x128xf32>,
    %c0_140 = arith.constant 0 : index
    %c0_141 = arith.constant 0 : index
    %112 = vector.load %arg5[%c0_140, %c0_141] : memref<18x128xf32, #tpu.memory_space<vmem>>, vector<16x128xf32>
    %c1_142 = arith.constant 1 : index
    %c0_143 = arith.constant 0 : index
    %c0_144 = arith.constant 0 : index
    %c0_145 = arith.constant 0 : index
    %113 = vector.load %arg2[%c1_142, %c0_143, %c0_144, %c0_145] : memref<4x3x128x128xf32, #tpu.memory_space<vmem>>, vector<1x1x128x128xf32>
    %114 = vector.shape_cast %113 : vector<1x1x128x128xf32> to vector<128x128xf32>
    %cst_146 = arith.constant dense<0.000000e+00> : vector<16x128xf32>
    %115 = tpu.matmul %112, %114, %cst_146 {dimension_numbers = #tpu.dot_dimension_numbers<[1], [0], [0], [1], [0, 0, 1, 1], [], []>} : vector<16x128xf32>, vector<128x128xf32>, vector<16x128xf32> -> vector<16x128xf32>
    %c1_147 = arith.constant 1 : index
    %c0_148 = arith.constant 0 : index
    %116 = vector.load %arg5[%c1_147, %c0_148] : memref<18x128xf32, #tpu.memory_space<vmem>>, vector<16x128xf32>
    %c1_149 = arith.constant 1 : index
    %c1_150 = arith.constant 1 : index
    %c0_151 = arith.constant 0 : index
    %c0_152 = arith.constant 0 : index
    %117 = vector.load %arg2[%c1_149, %c1_150, %c0_151, %c0_152] : memref<4x3x128x128xf32, #tpu.memory_space<vmem>>, vector<1x1x128x128xf32>
    %118 = vector.shape_cast %117 : vector<1x1x128x128xf32> to vector<128x128xf32>
    %cst_153 = arith.constant dense<0.000000e+00> : vector<16x128xf32>
    %119 = tpu.matmul %116, %118, %cst_153 {dimension_numbers = #tpu.dot_dimension_numbers<[1], [0], [0], [1], [0, 0, 1, 1], [], []>} : vector<16x128xf32>, vector<128x128xf32>, vector<16x128xf32> -> vector<16x128xf32>
    %120 = arith.addf %115, %119 : vector<16x128xf32>
    %c2_154 = arith.constant 2 : index
    %c0_155 = arith.constant 0 : index
    %121 = vector.load %arg5[%c2_154, %c0_155] : memref<18x128xf32, #tpu.memory_space<vmem>>, vector<16x128xf32>
    %c1_156 = arith.constant 1 : index
    %c2_157 = arith.constant 2 : index
    %c0_158 = arith.constant 0 : index
    %c0_159 = arith.constant 0 : index
    %122 = vector.load %arg2[%c1_156, %c2_157, %c0_158, %c0_159] : memref<4x3x128x128xf32, #tpu.memory_space<vmem>>, vector<1x1x128x128xf32>
    %123 = vector.shape_cast %122 : vector<1x1x128x128xf32> to vector<128x128xf32>
    %cst_160 = arith.constant dense<0.000000e+00> : vector<16x128xf32>
    %124 = tpu.matmul %121, %123, %cst_160 {dimension_numbers = #tpu.dot_dimension_numbers<[1], [0], [0], [1], [0, 0, 1, 1], [], []>} : vector<16x128xf32>, vector<128x128xf32>, vector<16x128xf32> -> vector<16x128xf32>
    %125 = arith.addf %120, %124 : vector<16x128xf32>
    %126 = arith.addf %125, %89 : vector<16x128xf32>
    %cst_161 = arith.constant 0.000000e+00 : f32
    %127 = vector.broadcast %cst_161 : f32 to vector<16x128xf32>
    %128 = arith.maximumf %126, %127 : vector<16x128xf32>
    %c1_162 = arith.constant 1 : index
    %c0_163 = arith.constant 0 : index
    %129 = vector.load %arg5[%c1_162, %c0_163] : memref<18x128xf32, #tpu.memory_space<vmem>>, vector<16x128xf32>
    tpu.vector_store %arg5[%c1_162, %c0_163], %128 {strides = array<i32>} : memref<18x128xf32, #tpu.memory_space<vmem>>, vector<16x128xf32>,
    %c0_164 = arith.constant 0 : index
    %c0_165 = arith.constant 0 : index
    %130 = vector.load %arg5[%c0_164, %c0_165] : memref<18x128xf32, #tpu.memory_space<vmem>>, vector<16x128xf32>
    %c2_166 = arith.constant 2 : index
    %c0_167 = arith.constant 0 : index
    %c0_168 = arith.constant 0 : index
    %c0_169 = arith.constant 0 : index
    %131 = vector.load %arg2[%c2_166, %c0_167, %c0_168, %c0_169] : memref<4x3x128x128xf32, #tpu.memory_space<vmem>>, vector<1x1x128x128xf32>
    %132 = vector.shape_cast %131 : vector<1x1x128x128xf32> to vector<128x128xf32>
    %cst_170 = arith.constant dense<0.000000e+00> : vector<16x128xf32>
    %133 = tpu.matmul %130, %132, %cst_170 {dimension_numbers = #tpu.dot_dimension_numbers<[1], [0], [0], [1], [0, 0, 1, 1], [], []>} : vector<16x128xf32>, vector<128x128xf32>, vector<16x128xf32> -> vector<16x128xf32>
    %c1_171 = arith.constant 1 : index
    %c0_172 = arith.constant 0 : index
    %134 = vector.load %arg5[%c1_171, %c0_172] : memref<18x128xf32, #tpu.memory_space<vmem>>, vector<16x128xf32>
    %c2_173 = arith.constant 2 : index
    %c1_174 = arith.constant 1 : index
    %c0_175 = arith.constant 0 : index
    %c0_176 = arith.constant 0 : index
    %135 = vector.load %arg2[%c2_173, %c1_174, %c0_175, %c0_176] : memref<4x3x128x128xf32, #tpu.memory_space<vmem>>, vector<1x1x128x128xf32>
    %136 = vector.shape_cast %135 : vector<1x1x128x128xf32> to vector<128x128xf32>
    %cst_177 = arith.constant dense<0.000000e+00> : vector<16x128xf32>
    %137 = tpu.matmul %134, %136, %cst_177 {dimension_numbers = #tpu.dot_dimension_numbers<[1], [0], [0], [1], [0, 0, 1, 1], [], []>} : vector<16x128xf32>, vector<128x128xf32>, vector<16x128xf32> -> vector<16x128xf32>
    %138 = arith.addf %133, %137 : vector<16x128xf32>
    %c2_178 = arith.constant 2 : index
    %c0_179 = arith.constant 0 : index
    %139 = vector.load %arg5[%c2_178, %c0_179] : memref<18x128xf32, #tpu.memory_space<vmem>>, vector<16x128xf32>
    %c2_180 = arith.constant 2 : index
    %c2_181 = arith.constant 2 : index
    %c0_182 = arith.constant 0 : index
    %c0_183 = arith.constant 0 : index
    %140 = vector.load %arg2[%c2_180, %c2_181, %c0_182, %c0_183] : memref<4x3x128x128xf32, #tpu.memory_space<vmem>>, vector<1x1x128x128xf32>
    %141 = vector.shape_cast %140 : vector<1x1x128x128xf32> to vector<128x128xf32>
    %cst_184 = arith.constant dense<0.000000e+00> : vector<16x128xf32>
    %142 = tpu.matmul %139, %141, %cst_184 {dimension_numbers = #tpu.dot_dimension_numbers<[1], [0], [0], [1], [0, 0, 1, 1], [], []>} : vector<16x128xf32>, vector<128x128xf32>, vector<16x128xf32> -> vector<16x128xf32>
    %143 = arith.addf %138, %142 : vector<16x128xf32>
    %c1_185 = arith.constant 1 : index
    %c0_186 = arith.constant 0 : index
    %c0_187 = arith.constant 0 : index
    %144 = vector.load %arg3[%c1_185, %c0_186, %c0_187] : memref<2x1x128xf32, #tpu.memory_space<vmem>>, vector<1x1x128xf32>
    %145 = vector.shape_cast %144 : vector<1x1x128xf32> to vector<1x128xf32>
    %146 = vector.broadcast %145 : vector<1x128xf32> to vector<16x128xf32>
    %147 = arith.addf %143, %146 : vector<16x128xf32>
    %cst_188 = arith.constant 0.000000e+00 : f32
    %148 = vector.broadcast %cst_188 : f32 to vector<16x128xf32>
    %149 = arith.maximumf %147, %148 : vector<16x128xf32>
    %c1_189 = arith.constant 1 : index
    %c0_190 = arith.constant 0 : index
    %150 = vector.load %arg5[%c1_189, %c0_190] : memref<18x128xf32, #tpu.memory_space<vmem>>, vector<16x128xf32>
    tpu.vector_store %arg5[%c1_189, %c0_190], %149 {strides = array<i32>} : memref<18x128xf32, #tpu.memory_space<vmem>>, vector<16x128xf32>,
    %c0_191 = arith.constant 0 : index
    %c0_192 = arith.constant 0 : index
    %151 = vector.load %arg5[%c0_191, %c0_192] : memref<18x128xf32, #tpu.memory_space<vmem>>, vector<16x128xf32>
    %c3_193 = arith.constant 3 : index
    %c0_194 = arith.constant 0 : index
    %c0_195 = arith.constant 0 : index
    %c0_196 = arith.constant 0 : index
    %152 = vector.load %arg2[%c3_193, %c0_194, %c0_195, %c0_196] : memref<4x3x128x128xf32, #tpu.memory_space<vmem>>, vector<1x1x128x128xf32>
    %153 = vector.shape_cast %152 : vector<1x1x128x128xf32> to vector<128x128xf32>
    %cst_197 = arith.constant dense<0.000000e+00> : vector<16x128xf32>
    %154 = tpu.matmul %151, %153, %cst_197 {dimension_numbers = #tpu.dot_dimension_numbers<[1], [0], [0], [1], [0, 0, 1, 1], [], []>} : vector<16x128xf32>, vector<128x128xf32>, vector<16x128xf32> -> vector<16x128xf32>
    %c1_198 = arith.constant 1 : index
    %c0_199 = arith.constant 0 : index
    %155 = vector.load %arg5[%c1_198, %c0_199] : memref<18x128xf32, #tpu.memory_space<vmem>>, vector<16x128xf32>
    %c3_200 = arith.constant 3 : index
    %c1_201 = arith.constant 1 : index
    %c0_202 = arith.constant 0 : index
    %c0_203 = arith.constant 0 : index
    %156 = vector.load %arg2[%c3_200, %c1_201, %c0_202, %c0_203] : memref<4x3x128x128xf32, #tpu.memory_space<vmem>>, vector<1x1x128x128xf32>
    %157 = vector.shape_cast %156 : vector<1x1x128x128xf32> to vector<128x128xf32>
    %cst_204 = arith.constant dense<0.000000e+00> : vector<16x128xf32>
    %158 = tpu.matmul %155, %157, %cst_204 {dimension_numbers = #tpu.dot_dimension_numbers<[1], [0], [0], [1], [0, 0, 1, 1], [], []>} : vector<16x128xf32>, vector<128x128xf32>, vector<16x128xf32> -> vector<16x128xf32>
    %159 = arith.addf %154, %158 : vector<16x128xf32>
    %c2_205 = arith.constant 2 : index
    %c0_206 = arith.constant 0 : index
    %160 = vector.load %arg5[%c2_205, %c0_206] : memref<18x128xf32, #tpu.memory_space<vmem>>, vector<16x128xf32>
    %c3_207 = arith.constant 3 : index
    %c2_208 = arith.constant 2 : index
    %c0_209 = arith.constant 0 : index
    %c0_210 = arith.constant 0 : index
    %161 = vector.load %arg2[%c3_207, %c2_208, %c0_209, %c0_210] : memref<4x3x128x128xf32, #tpu.memory_space<vmem>>, vector<1x1x128x128xf32>
    %162 = vector.shape_cast %161 : vector<1x1x128x128xf32> to vector<128x128xf32>
    %cst_211 = arith.constant dense<0.000000e+00> : vector<16x128xf32>
    %163 = tpu.matmul %160, %162, %cst_211 {dimension_numbers = #tpu.dot_dimension_numbers<[1], [0], [0], [1], [0, 0, 1, 1], [], []>} : vector<16x128xf32>, vector<128x128xf32>, vector<16x128xf32> -> vector<16x128xf32>
    %164 = arith.addf %159, %163 : vector<16x128xf32>
    %165 = arith.addf %164, %128 : vector<16x128xf32>
    %c1_212 = arith.constant 1 : index
    %c0_213 = arith.constant 0 : index
    %c0_214 = arith.constant 0 : index
    %166 = vector.load %arg4[%c1_212, %c0_213, %c0_214] : memref<2x16x128xf32, #tpu.memory_space<vmem>>, vector<1x16x128xf32>
    %167 = vector.shape_cast %166 : vector<1x16x128xf32> to vector<16x128xf32>
    %168 = vector.shape_cast %165 : vector<16x128xf32> to vector<1x16x128xf32>
    tpu.vector_store %arg4[%c1_212, %c0_213, %c0_214], %168 {strides = array<i32>} : memref<2x16x128xf32, #tpu.memory_space<vmem>>, vector<1x16x128xf32>,
    return
  }
  func.func @transform_0(%arg0: i32) -> (i32, i32, i32) {
    %c0_i32 = arith.constant 0 : i32
    %c0_i32_0 = arith.constant 0 : i32
    %c0_i32_1 = arith.constant 0 : i32
    return %arg0, %c0_i32, %c0_i32_0 : i32, i32, i32
  }
  func.func @transform_1(%arg0: i32) -> (i32, i32, i32, i32) {
    %c0_i32 = arith.constant 0 : i32
    %c0_i32_0 = arith.constant 0 : i32
    %c0_i32_1 = arith.constant 0 : i32
    %c0_i32_2 = arith.constant 0 : i32
    %c0_i32_3 = arith.constant 0 : i32
    return %c0_i32, %c0_i32_0, %c0_i32_1, %c0_i32_2 : i32, i32, i32, i32
  }
  func.func @transform_2(%arg0: i32) -> (i32, i32, i32) {
    %c0_i32 = arith.constant 0 : i32
    %c0_i32_0 = arith.constant 0 : i32
    %c0_i32_1 = arith.constant 0 : i32
    %c0_i32_2 = arith.constant 0 : i32
    return %c0_i32, %c0_i32_0, %c0_i32_1 : i32, i32, i32
  }
  func.func @transform_3(%arg0: i32) -> (i32, i32, i32) {
    %c0_i32 = arith.constant 0 : i32
    %c0_i32_0 = arith.constant 0 : i32
    %c0_i32_1 = arith.constant 0 : i32
    return %arg0, %c0_i32, %c0_i32_0 : i32, i32, i32
  }
}

</mosaic_0001>

<bundles_post_ra>
// kernel: tpu_custom_call.1
= control target key start
LH: loop header
LB: loop body
LE: loop exit
PB: predicated region body
PF: predicated region fallthrough
CT: control target
= control target key end

     0   :  { %8 = vsyncpa [#allocation4], 0  ;;  %s5412_s0 = inlined_call_operand.hbm [shape: f32[4,16,128], index: 0, kind: input, shape index: {}]   ;;  %s5413_s1 = inlined_call_operand.hbm [shape: f32[4,3,128,128], index: 1, kind: input, shape index: {}]   ;;  %s5414_s2 = inlined_call_operand.vmem [shape: f32[2,1,128], index: 2, kind: input, shape index: {}]   ;;  %s5415_s3 = inlined_call_operand.hbm [shape: f32[4,16,128], index: 3, kind: output, shape index: {}]  }
   0x1   :  { %10 = vsyncpa [#allocation4 + $0x1], 0 }
   0x2   :  { %11 = vsyncpa [#allocation7], 0 }
   0x3   :  { %12 = vsyncpa [#allocation5], 0 }
   0x4   :  { %14 = vsyncpa [#allocation5 + $0x1], 0  ;;  %s4977_s12 = smov 0   ;;  %s4979_s13 = smov 0  }
   0x5   :  { %s4981_s14 = smov 0   ;;  %s4983_s15 = smov 0  }
   0x6 LB: > { %s4998_s16 = sadd.s32 4294967295, %s4947_s15   ;;  %s2653_s17 = sadd.s32 4294967294, %s4947_s15   ;;  %s4947_s15 = sphi %s4983_s15, %s5435_s15   ;;  %s4943_s14 = sphi %s4981_s14, %s5434_s14   ;;  %s4939_s13 = sphi %s4979_s13, %s5433_s13   ;;  %s4935_s12 = sphi %s4977_s12, %s5432_s12  }
   0x7   : > { %p40_p0 = scmp.ne.s32.totalorder %s4939_s13, %s4935_s12  ;;  %p5416_p1 = scmp.eq.s32.totalorder %s4998_s16, 0 }
   0x8   : > { %p112_p3 = scmp.eq.s32.totalorder %s2653_s17, 1  ;;  %p2654_p5 = scmp.ge.s32.totalorder %s4947_s15, 1 }
   0x9   : > { %p5007_p4 = por %p5416_p1, %p40_p0  ;;  %p119_p7 = scmp.lt.s32.totalorder %s4947_s15, 3 }
   0xa   : > { %p5012_p6 = por %p112_p3, %p40_p0  ;;  %s4949_s21 = smov [#allocation6]  }
   0xb   : > { %s5419_s18 = scalar_select %p5007_p4, 1, 0 }
   0xc   : > { %s5420_s19 = scalar_select %p5012_p6, 1, 0 }
   0xd   : > { %p5017_p8 = pnand %p2654_p5, %p119_p7  ;;  %s131_s22 = sshll.u32 %s4949_s21, 4  ;;  %s5021_s22 = int_to_ptr.vmem [resolvable:$true] %s131_s22 }
   0xe   : > { %s5033_s24 = sadd.s32 1, %s4947_s15   ;;  %s27_s25 = sadd.s32 1, %s4943_s14 }
   0xf   : > { %s5421_s20 = scalar_select %p5017_p8, 1, 0 }
  0x10   : > { %p4765_p9 = pneg %p5017_p8  ;;  %s24_s26 = ssub.s32 %s4947_s15, %s5033_s24 }
  0x11   : > { %s4819_s29 = scalar_lea.hbm %s5413_s1, 24576 }
  0x12   : > { %p5028_p11 = pnand %p4765_p9, %p5416_p1  ;;  %p4820_p12 = scmp.ne.s32.totalorder %s5413_s1, %s4819_s29 }
  0x13   : > { %p4826_p5 = scmp.lt.u32.totalorder %s4819_s29, %s5413_s1 }
  0x14   : > { %p4821_p13 = pneg %p5028_p11 }
  0x16   : > { %p4822_p0 = pnand %p4821_p13, %p4820_p12 }
  0x18   : > { %p4823_p3 = pneg %p4822_p0 }
  0x1a   : > { %p4828_p7 = pnand %p4826_p5, %p4823_p3 }
  0x1c   : > { %4831 = shalt.err (!%p4828_p7)
}
  0x1d   : > { %s4832_s7 = scalar_lea.vmem %s5021_s22, 24576  ;;  %p4840_p2 = scmp.lt.s32.totalorder %s5021_s22, %s5021_s22 }
  0x1e   : > { %p4833_p9 = scmp.ne.s32.totalorder %s5021_s22, %s4832_s7  ;;  %p4841_p6 = scmp.lt.s32.totalorder %s4832_s7, %s4832_s7 }
  0x20   : > { %p4835_p10 = pnand %p4833_p9, %p4821_p13  ;;  %p4842_p4 = por %p4841_p6, %p4840_p2 }
  0x22   : > { %p4836_p1 = pneg %p4835_p10 }
  0x24   : > { %p4843_p8 = pnand %p4842_p4, %p4836_p1 }
  0x26   : > { %4846 = shalt.err (!%p4843_p8)
}
  0x27   : > { %s4950_s8 = smov 128   ;;  %s4951_s9 = smov 8  }
  0x28   : > { %4768 = dma.hbm_to_vmem [thread:$0]  (!%p5028_p11), %s5413_s1, 24576, %s5021_s22, [#allocation7], %s4950_s8, %s4950_s8, %s4951_s9  }
  0x29   : > { %p25_p1 = scmp.eq.s32.totalorder %s24_s26, 0  ;;  %p34_p2 = scmp.ne.s32.totalorder %s4943_s14, %s4939_s13 }
  0x2a   : > { %p35_p4 = scmp.eq.s32.totalorder %s4947_s15, 0  ;;  %p4778_p6 = scmp.lt.s32.totalorder %s4947_s15, 2 }
  0x2b   : > { %s5067_s17 = scalar_select %p25_p1, %s4943_s14, %s27_s25  }
  0x2c   : > { %p36_p8 = por %p35_p4, %p34_p2  ;;  %p5423_p10 = scmp.eq.s32.totalorder %s4998_s16, 1 }
  0x2d   : > { %s148_s23 = sand.u32 1, %s4943_s14   ;;  %s2682_s27 = sshll.u32 %s4947_s15, 9 }
  0x2e   : > { %p5071_p12 = por %p5423_p10, %p34_p2  ;;  %s2657_s28 = sshll.u32 %s148_s23, 5 }
  0x2f   : > { %s5080_s4 = scalar_lea.hbm %s5412_s0, %s2682_s27  ;;  %s152_s22 = scalar_lea.vmem [#allocation3], %s2657_s28 }
  0x30   : > { %s160_s25 = sshll.u32 %s152_s22, 4  ;;  %p5082_p11 = pnand %p4778_p6, %p36_p8  ;;  %s5086_s25 = int_to_ptr.vmem [resolvable:$true] %s160_s25 }
  0x31   : > { %s5088_s5 = scalar_lea.sflag [#allocation4], %s148_s23  ;;  %s4847_s6 = scalar_lea.hbm %s5080_s4, 512 }
  0x32   : > { %p4848_p13 = scmp.ne.s32.totalorder %s5080_s4, %s4847_s6  ;;  %p4849_p0 = pneg %p5082_p11 }
  0x33   : > { %s4852_s11 = scalar_lea.hbm %s5412_s0, 1024  ;;  %p4853_p7 = scmp.lt.u32.totalorder %s5080_s4, %s5412_s0 }
  0x34   : > { %p4850_p3 = pnand %p4849_p0, %p4848_p13  ;;  %p4854_p9 = scmp.lt.u32.totalorder %s4852_s11, %s4847_s6 }
  0x35   : > { %p4856_p2 = scmp.lt.u32.totalorder %s4847_s6, %s5080_s4 }
  0x36   : > { %p4851_p5 = pneg %p4850_p3  ;;  %p4855_p1 = por %p4854_p9, %p4853_p7 }
  0x38   : > { %p4857_p4 = por %p4856_p2, %p4855_p1 }
  0x3a   : > { %p4858_p6 = pnand %p4857_p4, %p4851_p5 }
  0x3c   : > { %4861 = shalt.err (!%p4858_p6)
}
  0x3d   : > { %s4862_s23 = scalar_lea.vmem %s5086_s25, 512  ;;  %s4952_s29 = smov [#allocation3]  }
  0x3e   : > { %p4863_p8 = scmp.ne.s32.totalorder %s5086_s25, %s4862_s23  ;;  %s4867_s30 = sshll.u32 %s4952_s29, 4  ;;  %s4868_s30 = int_to_ptr.vmem [resolvable:$false] %s4867_s30 }
  0x3f   : > { %s4869_s22 = scalar_lea.vmem %s4868_s30, 1024  ;;  %p4870_p3 = scmp.lt.s32.totalorder %s5086_s25, %s4868_s30 }
  0x40   : > { %p4865_p10 = pnand %p4863_p8, %p4849_p0  ;;  %p4871_p7 = scmp.lt.s32.totalorder %s4869_s22, %s4862_s23 }
  0x42   : > { %p4866_p13 = pneg %p4865_p10  ;;  %p4872_p9 = por %p4871_p7, %p4870_p3 }
  0x44   : > { %p4873_p1 = pnand %p4872_p9, %p4866_p13 }
  0x46   : > { %4876 = shalt.err (!%p4873_p1)
}
  0x47   : > { %4772 = dma.hbm_to_vmem [thread:$0]  (!%p5082_p11), %s5080_s4, 512, %s5086_s25, %s5088_s5, %s4950_s8, %s4950_s8, %s4951_s9  }
  0x48   : > { %p5426_p0 = scmp.ne.s32.totalorder %s5421_s20, 0 }
  0x49   : > { %s5122_s6 = sand.u32 (!%p5426_p0), 1, %s4939_s13   ;;  %p5427_p5 = scmp.ne.s32.totalorder (!%p5426_p0), %s5419_s18, 0 }
  0x4a   : > { %172 = sbr.rel (%p5426_p0) target bundleno = 2091 (0x82b), region = 32  ;;  %s2662_s7 = sshll.u32 (!%p5426_p0), %s5122_s6, 5 }
  0x4b   : > { %s175_s10 = scalar_lea.sflag (!%p5426_p0), [#allocation4], %s5122_s6  ;;  %s5128_s26 = scalar_lea.vmem (!%p5426_p0), [#allocation3], %s2662_s7 }
  0x51   : > { %4922 = dma.done.wait (%p5427_p5), %s175_s10, 512  }
  0x52   : > { %4924 = vsyncadd (%p5427_p5), %s175_s10, 4294966784  ;;  %p5428_p11 = scmp.eq.s32.totalorder %s4998_s16, 0 }
  0x54   : > { %4926 = dma.done.wait (%p5428_p11), [#allocation7], 24576   ;;  %p5429_p2 = pmov %p5428_p11 }
  0x55   : > { %v4953_v0 = vmov 0.0   ;;  %v236_v1 = vld [vmem:[#allocation6 + $0x80] sm:$0xff]  ;;  %v237_v2 = vld [vmem:[#allocation6 + $0x88] sm:$0xff]  ;;  %v238_v3 = vld [vmem:[#allocation6 + $0x90] sm:$0xff]  ;;  %s5314_s5 = scalar_lea.vmem [#allocation8], %s2662_s7  ;;  %s2684_s23 = sshll.u32 %s4998_s16, 9 }
  0x56   : > { %4928 = vsyncadd (%p5429_p2), [#allocation7], 4294942720  ;;  %207 = vst [vmem:[#allocation2] sm:$0x1] %v4953_v0  ;;  %v5138_v4 = vpack.c.bf16 %v237_v2, %v236_v1  ;;  %v239_v5 = vld [vmem:[#allocation6 + $0x98] sm:$0xff]  ;;  %v240_v7 = vld [vmem:[#allocation6 + $0xa0] sm:$0xff]  ;;  %s5365_s22 = scalar_lea.hbm %s5415_s3, %s2684_s23 }
  0x57   : > { %208 = vst [vmem:[#allocation2 + $0x11] sm:$0x1] %v4953_v0  ;;  %v5140_v6 = vpack.c.bf16 %v239_v5, %v238_v3  ;;  %v241_v8 = vld [vmem:[#allocation6 + $0xa8] sm:$0xff]  ;;  %v209_v10 = vld [vmem:[%s5128_s26] sm:$0xff]  ;;  %v242_v11 = vld [vmem:[#allocation6 + $0xb0] sm:$0xff]  ;;  %s2570_s28 = sshll.u32 %s5314_s5, 4  ;;  %s5359_s28 = int_to_ptr.vmem [resolvable:$true] %s2570_s28 }
  0x58   : > { %3958 = vmatprep.subr.bf16.mxu0 %v5138_v4  ;;  %v5145_v9 = vpack.c.bf16 %v241_v8, %v240_v7  ;;  %v243_v12 = vld [vmem:[#allocation6 + $0xb8] sm:$0xff]  ;;  %v5148_v13 = vmax.f32 %v209_v10, 0.0  ;;  %v210_v14 = vld [vmem:[%s5128_s26 + $0x8] sm:$0xff]  ;;  %v244_v17 = vld [vmem:[#allocation6 + $0xc0] sm:$0xff]  ;;  %s2556_s7 = scalar_lea.sflag [#allocation5], %s5122_s6  ;;  %s4877_s16 = scalar_lea.vmem %s5359_s28, 512 }
  0x59   : > { %3960 = vmatpush3.bf16.msra.mxu0 %v5138_v4  ;;  %v5151_v15 = vmax.f32 %v210_v14, 0.0  ;;  %v5157_v16 = vpack.c.bf16 %v243_v12, %v242_v11  ;;  %v245_v18 = vld [vmem:[#allocation6 + $0xc8] sm:$0xff]  ;;  %v246_v20 = vld [vmem:[#allocation6 + $0xd0] sm:$0xff]  ;;  %v247_v21 = vld [vmem:[#allocation6 + $0xd8] sm:$0xff]  ;;  %p4878_p4 = scmp.ne.s32.totalorder %s5359_s28, %s4877_s16  ;;  %s4954_s10 = smov [#allocation8]  }
  0x5a   : > { %3962 = vmatprep.subr.bf16.mxu0 %v5140_v6  ;;  %213 = vst [vmem:[#allocation2 + $0x1] sm:$0xff] %v5148_v13  ;;  %3149 = vmatprep.mubr.f32.mxu0 %v5148_v13  ;;  %v5162_v19 = vpack.c.bf16 %v245_v18, %v244_v17  ;;  %v5166_v22 = vpack.c.bf16 %v247_v21, %v246_v20  ;;  %v248_v23 = vld [vmem:[#allocation6 + $0xe0] sm:$0xff]  ;;  %v249_v24 = vld [vmem:[#allocation6 + $0xe8] sm:$0xff]  ;;  %v535_v27 = vld [vmem:[#allocation6 + $0x210] sm:$0xff] }
  0x5b   : > { %214 = vst [vmem:[#allocation2 + $0x9] sm:$0xff] %v5151_v15  ;;  %v533_v25 = vld [vmem:[#allocation6 + $0x200] sm:$0xff]  ;;  %v534_v26 = vld [vmem:[#allocation6 + $0x208] sm:$0xff]  ;;  %v536_v29 = vld [vmem:[#allocation6 + $0x218] sm:$0xff]  ;;  %v5170_v33 = vpack.c.bf16 %v249_v24, %v248_v23  ;;  %p4879_p6 = pnand %p4878_p4, %p5071_p12 }
  0x5c   : > { %v4053_v28 = vpack.c.bf16 %v534_v26, %v533_v25  ;;  %v4057_v30 = vpack.c.bf16 %v536_v29, %v535_v27  ;;  %v537_v31 = vld [vmem:[#allocation6 + $0x220] sm:$0xff]  ;;  %v538_v32 = vld [vmem:[#allocation6 + $0x228] sm:$0xff]  ;;  %v250_v34 = vld [vmem:[#allocation6 + $0xf0] sm:$0xff] }
  0x5d   : > { %3964 = vmatpush3.bf16.msra.mxu0 %v5140_v6  ;;  %v251_v35 = vld [vmem:[#allocation6 + $0xf8] sm:$0xff]  ;;  %v4061_v36 = vpack.c.bf16 %v538_v32, %v537_v31  ;;  %v539_v37 = vld [vmem:[#allocation6 + $0x230] sm:$0xff]  ;;  %v217_v40 = vld [vmem:[#allocation6] sm:$0xff]  ;;  %p4880_p8 = pneg %p4879_p6 }
  0x5e   : > { %3966 = vmatprep.subr.bf16.mxu0 %v5145_v9  ;;  %4054 = vmatprep.subr.bf16.mxu1 %v4053_v28  ;;  %v540_v38 = vld [vmem:[#allocation6 + $0x238] sm:$0xff]  ;;  %v5174_v39 = vpack.c.bf16 %v251_v35, %v250_v34  ;;  %v218_v41 = vld [vmem:[#allocation6 + $0x8] sm:$0xff]  ;;  %v541_v43 = vld [vmem:[#allocation6 + $0x240] sm:$0xff] }
  0x5f   : > { %4056 = vmatpush3.bf16.msra.mxu1 %v4053_v28  ;;  %v4065_v42 = vpack.c.bf16 %v540_v38, %v539_v37  ;;  %v542_v44 = vld [vmem:[#allocation6 + $0x248] sm:$0xff]  ;;  %v5178_v45 = vpack.c.bf16 %v218_v41, %v217_v40  ;;  %v219_v46 = vld [vmem:[#allocation6 + $0x10] sm:$0xff]  ;;  %v220_v47 = vld [vmem:[#allocation6 + $0x18] sm:$0xff] }
  0x60   : > { %4058 = vmatprep.subr.bf16.mxu1 %v4057_v30  ;;  %v4069_v48 = vpack.c.bf16 %v542_v44, %v541_v43  ;;  %v5182_v49 = vpack.c.bf16 %v220_v47, %v219_v46  ;;  %v221_v51 = vld [vmem:[#allocation6 + $0x20] sm:$0xff]  ;;  %v222_v52 = vld [vmem:[#allocation6 + $0x28] sm:$0xff]  ;;  %v223_v54 = vld [vmem:[#allocation6 + $0x30] sm:$0xff] }
  0x61   : > { %3968 = vmatpush3.bf16.msra.mxu0 %v5145_v9  ;;  %v215_v50 = vld [vmem:[#allocation2] sm:$0xff]  ;;  %v5187_v53 = vpack.c.bf16 %v222_v52, %v221_v51  ;;  %v224_v55 = vld [vmem:[#allocation6 + $0x38] sm:$0xff]  ;;  %v225_v57 = vld [vmem:[#allocation6 + $0x40] sm:$0xff] }
  0x62   : > { %3970 = vmatprep.subr.bf16.mxu0 %v5157_v16  ;;  %v5191_v56 = vpack.c.bf16 %v224_v55, %v223_v54  ;;  %v226_v58 = vld [vmem:[#allocation6 + $0x48] sm:$0xff]  ;;  %v227_v60 = vld [vmem:[#allocation6 + $0x50] sm:$0xff]  ;;  %v228_v61 = vld [vmem:[#allocation6 + $0x58] sm:$0xff] }
  0x63   : > { %4060 = vmatpush3.bf16.msra.mxu1 %v4057_v30  ;;  %v4005_v59 = vpack.c.bf16 %v226_v58, %v225_v57  ;;  %v4009_v62 = vpack.c.bf16 %v228_v61, %v227_v60  ;;  %v229_v63 = vld [vmem:[#allocation6 + $0x60] sm:$0xff]  ;;  %v230_v0 = vld [vmem:[#allocation6 + $0x68] sm:$0xff]  ;;  %v231_v2 = vld [vmem:[#allocation6 + $0x70] sm:$0xff] }
  0x64   : > { %4062 = vmatprep.subr.bf16.mxu1 %v4061_v36  ;;  %v4013_v1 = vpack.c.bf16 %v230_v0, %v229_v63  ;;  %v232_v3 = vld [vmem:[#allocation6 + $0x78] sm:$0xff]  ;;  %v405_v7 = vld [vmem:[#allocation6 + $0x100] sm:$0xff]  ;;  %v406_v8 = vld [vmem:[#allocation6 + $0x108] sm:$0xff] }
  0x65   : > { %3972 = vmatpush3.bf16.msra.mxu0 %v5157_v16  ;;  %v4017_v5 = vpack.c.bf16 %v232_v3, %v231_v2  ;;  %v4021_v10 = vpack.c.bf16 %v406_v8, %v405_v7  ;;  %v407_v11 = vld [vmem:[#allocation6 + $0x110] sm:$0xff]  ;;  %v408_v12 = vld [vmem:[#allocation6 + $0x118] sm:$0xff]  ;;  %v409_v20 = vld [vmem:[#allocation6 + $0x120] sm:$0xff] }
  0x66   : > { %3974 = vmatprep.subr.bf16.mxu0 %v5162_v19  ;;  %v216_v14 = vld [vmem:[#allocation2 + $0x8] sm:$0xff]  ;;  %v4025_v17 = vpack.c.bf16 %v408_v12, %v407_v11  ;;  %v410_v21 = vld [vmem:[#allocation6 + $0x128] sm:$0xff]  ;;  %v412_v25 = vld [vmem:[#allocation6 + $0x138] sm:$0xff] }
  0x67   : > { %4064 = vmatpush3.bf16.msra.mxu1 %v4061_v36  ;;  %v402_v18 = vld [vmem:[#allocation2 + $0x2] sm:$0xff]  ;;  %v4029_v23 = vpack.c.bf16 %v410_v21, %v409_v20  ;;  %v413_v27 = vld [vmem:[#allocation6 + $0x140] sm:$0xff]  ;;  %v416_v31 = vld [vmem:[#allocation6 + $0x158] sm:$0xff] }
  0x68   : > { %4066 = vmatprep.subr.bf16.mxu1 %v4065_v42  ;;  %v411_v24 = vld [vmem:[#allocation6 + $0x130] sm:$0xff]  ;;  %v414_v28 = vld [vmem:[#allocation6 + $0x148] sm:$0xff]  ;;  %v417_v34 = vld [vmem:[#allocation6 + $0x160] sm:$0xff] }
  0x69   : > { %3976 = vmatpush3.bf16.msra.mxu0 %v5162_v19  ;;  %v4033_v26 = vpack.c.bf16 %v412_v25, %v411_v24  ;;  %v4037_v29 = vpack.c.bf16 %v414_v28, %v413_v27  ;;  %v415_v30 = vld [vmem:[#allocation6 + $0x150] sm:$0xff]  ;;  %v418_v35 = vld [vmem:[#allocation6 + $0x168] sm:$0xff]  ;;  %v420_v38 = vld [vmem:[#allocation6 + $0x178] sm:$0xff] }
  0x6a   : > { %3978 = vmatprep.subr.bf16.mxu0 %v5166_v22  ;;  %v4041_v32 = vpack.c.bf16 %v416_v31, %v415_v30  ;;  %v4045_v36 = vpack.c.bf16 %v418_v35, %v417_v34  ;;  %v419_v37 = vld [vmem:[#allocation6 + $0x170] sm:$0xff]  ;;  %v544_v43 = vld [vmem:[#allocation6 + $0x258] sm:$0xff]  ;;  %v545_v46 = vld [vmem:[#allocation6 + $0x260] sm:$0xff] }
  0x6b   : > { %4068 = vmatpush3.bf16.msra.mxu1 %v4065_v42  ;;  %v4049_v40 = vpack.c.bf16 %v420_v38, %v419_v37  ;;  %v403_v41 = vld [vmem:[#allocation2 + $0xa] sm:$0xff]  ;;  %v546_v47 = vld [vmem:[#allocation6 + $0x268] sm:$0xff]  ;;  %v514_v54 = vld [vmem:[#allocation6 + $0x180] sm:$0xff] }
  0x6c   : > { %4070 = vmatprep.subr.bf16.mxu1 %v4069_v48  ;;  %v543_v42 = vld [vmem:[#allocation6 + $0x250] sm:$0xff]  ;;  %v548_v51 = vld [vmem:[#allocation6 + $0x278] sm:$0xff]  ;;  %v515_v55 = vld [vmem:[#allocation6 + $0x188] sm:$0xff] }
  0x6d   : > { %3980 = vmatpush3.bf16.msra.mxu0 %v5166_v22  ;;  %v4073_v44 = vpack.c.bf16 %v544_v43, %v543_v42  ;;  %v4085_v57 = vpack.c.bf16 %v515_v55, %v514_v54  ;;  %v823_v58 = vld [vmem:[#allocation6 + $0x380] sm:$0xff]  ;;  %v825_v60 = vld [vmem:[#allocation6 + $0x390] sm:$0xff]  ;;  %v2665_v12 = vld [vmem:[%s5414_s2] ss:$0 sm:$0xff] }
  0x6e   : > { %3982 = vmatprep.subr.bf16.mxu0 %v5170_v33  ;;  %v827_v0 = vld [vmem:[#allocation6 + $0x3a0] sm:$0xff]  ;;  %v829_v3 = vld [vmem:[#allocation6 + $0x3b0] sm:$0xff]  ;;  %v519_v28 = vld [vmem:[#allocation6 + $0x1a8] sm:$0xff] }
  0x6f   : > { %4072 = vmatpush3.bf16.msra.mxu1 %v4069_v48  ;;  %v4077_v48 = vpack.c.bf16 %v546_v47, %v545_v46  ;;  %v831_v8 = vld [vmem:[#allocation6 + $0x3c0] sm:$0xff]  ;;  %v516_v21 = vld [vmem:[#allocation6 + $0x190] sm:$0xff]  ;;  %v521_v31 = vld [vmem:[#allocation6 + $0x1b8] sm:$0xff] }
  0x70   : > { %4074 = vmatprep.subr.bf16.mxu1 %v4073_v44  ;;  %v518_v27 = vld [vmem:[#allocation6 + $0x1a0] sm:$0xff]  ;;  %v520_v30 = vld [vmem:[#allocation6 + $0x1b0] sm:$0xff]  ;;  %v527_v43 = vld [vmem:[#allocation6 + $0x1e8] sm:$0xff] }
  0x71   : > { %3984 = vmatpush3.bf16.msra.mxu0 %v5170_v33  ;;  %v4097_v34 = vpack.c.bf16 %v521_v31, %v520_v30  ;;  %v522_v35 = vld [vmem:[#allocation6 + $0x1c0] sm:$0xff]  ;;  %v524_v38 = vld [vmem:[#allocation6 + $0x1d0] sm:$0xff]  ;;  %v529_v47 = vld [vmem:[#allocation6 + $0x1f8] sm:$0xff] }
  0x72   : > { %3986 = vmatprep.subr.bf16.mxu0 %v5174_v39  ;;  %v526_v42 = vld [vmem:[#allocation6 + $0x1e0] sm:$0xff]  ;;  %v528_v46 = vld [vmem:[#allocation6 + $0x1f0] sm:$0xff]  ;;  %v705_v55 = vld [vmem:[#allocation6 + $0x298] sm:$0xff] }
  0x73   : > { %4076 = vmatpush3.bf16.msra.mxu1 %v4073_v44  ;;  %v4109_v44 = vpack.c.bf16 %v527_v43, %v526_v42  ;;  %v704_v54 = vld [vmem:[#allocation6 + $0x290] sm:$0xff]  ;;  %v838_v30 = vld [vmem:[#allocation6 + $0x3f8] sm:$0xff]  ;;  %v1125_v43 = vld [vmem:[#allocation6 + $0x520] sm:$0xff] }
  0x74   : > { %4078 = vmatprep.subr.bf16.mxu1 %v4077_v48 }
  0x75   : > { %3988 = vmatpush3.bf16.msra.mxu0 %v5174_v39 }
  0x76   : > { %3990 = vmatprep.subr.bf16.mxu0 %v5178_v45 }
  0x77   : > { %4080 = vmatpush3.bf16.msra.mxu1 %v4077_v48  ;;  %v4113_v48 = vpack.c.bf16 %v529_v47, %v528_v46  ;;  %v1127_v47 = vld [vmem:[#allocation6 + $0x530] sm:$0xff] }
  0x78   : > { %3150 = vmatmul.mubr.f32.vlgmr.msra.gmra.mrb[0].mxu0 %v5151_v15 }
  0x79   : > { %3992 = vmatpush3.bf16.msra.mxu0 %v5178_v45  ;;  %3184 = vmatprep.mubr.f32.mxu0 %v215_v50  ;;  %v547_v50 = vld [vmem:[#allocation6 + $0x270] sm:$0xff] }
  0x7a   : > { %3994 = vmatprep.subr.bf16.mxu0 %v5182_v49  ;;  %v4081_v52 = vpack.c.bf16 %v548_v51, %v547_v50  ;;  %v702_v50 = vld [vmem:[#allocation6 + $0x280] sm:$0xff]  ;;  %v703_v51 = vld [vmem:[#allocation6 + $0x288] sm:$0xff] }
  0x7c   : > { %4082 = vmatprep.subr.bf16.mxu1 %v4081_v52 }
  0x7d   : > { %3996 = vmatpush3.bf16.msra.mxu0 %v5182_v49  ;;  %4084 = vmatpush3.bf16.msra.mxu1 %v4081_v52  ;;  %v4117_v52 = vpack.c.bf16 %v703_v51, %v702_v50  ;;  %v1129_v51 = vld [vmem:[#allocation6 + $0x540] sm:$0xff] }
  0x7e   : > { %3998 = vmatprep.subr.bf16.mxu0 %v5187_v53  ;;  %4086 = vmatprep.subr.bf16.mxu1 %v4085_v57 }
  0x81   : > { %4000 = vmatpush3.bf16.msra.mxu0 %v5187_v53 }
  0x82   : > { %4002 = vmatprep.subr.bf16.mxu0 %v5191_v56 }
  0x85   : > { %4004 = vmatpush3.bf16.msra.mxu0 %v5191_v56 }
  0x86   : > { %4006 = vmatprep.subr.bf16.mxu0 %v4005_v59 }
  0x89   : > { %4008 = vmatpush3.bf16.msra.mxu0 %v4005_v59  ;;  %v824_v59 = vld [vmem:[#allocation6 + $0x388] sm:$0xff] }
  0x8a   : > { %4010 = vmatprep.subr.bf16.mxu0 %v4009_v62  ;;  %v4149_v61 = vpack.c.bf16 %v824_v59, %v823_v58  ;;  %v706_v59 = vld [vmem:[#allocation6 + $0x2a0] sm:$0xff] }
  0x8d   : > { %4012 = vmatpush3.bf16.msra.mxu0 %v4009_v62  ;;  %v826_v62 = vld [vmem:[#allocation6 + $0x398] sm:$0xff] }
  0x8e   : > { %4014 = vmatprep.subr.bf16.mxu0 %v4013_v1  ;;  %v4153_v63 = vpack.c.bf16 %v826_v62, %v825_v60  ;;  %v707_v60 = vld [vmem:[#allocation6 + $0x2a8] sm:$0xff] }
  0x8f   : > { %v4125_v62 = vpack.c.bf16 %v707_v60, %v706_v59  ;;  %v806_v60 = vld [vmem:[#allocation6 + $0x310] sm:$0xff] }
  0x91   : > { %4016 = vmatpush3.bf16.msra.mxu0 %v4013_v1  ;;  %v828_v1 = vld [vmem:[#allocation6 + $0x3a8] sm:$0xff] }
  0x92   : > { %4018 = vmatprep.subr.bf16.mxu0 %v4017_v5  ;;  %v4157_v2 = vpack.c.bf16 %v828_v1, %v827_v0  ;;  %v709_v0 = vld [vmem:[#allocation6 + $0x2b8] sm:$0xff] }
  0x95   : > { %4020 = vmatpush3.bf16.msra.mxu0 %v4017_v5  ;;  %v830_v5 = vld [vmem:[#allocation6 + $0x3b8] sm:$0xff] }
  0x96   : > { %4022 = vmatprep.subr.bf16.mxu0 %v4021_v10  ;;  %v4161_v7 = vpack.c.bf16 %v830_v5, %v829_v3  ;;  %v711_v3 = vld [vmem:[#allocation6 + $0x2c8] sm:$0xff] }
  0x98   : > { %3185 = vmatmul.mubr.f32.vlgmr.msra.gmra.mrb[0].mxu0 %v216_v14 }
  0x99   : > { %4024 = vmatpush3.bf16.msra.mxu0 %v4021_v10  ;;  %3219 = vmatprep.mubr.f32.mxu0 %v402_v18  ;;  %v832_v10 = vld [vmem:[#allocation6 + $0x3c8] sm:$0xff] }
  0x9a   : > { %4026 = vmatprep.subr.bf16.mxu0 %v4025_v17  ;;  %v4165_v11 = vpack.c.bf16 %v832_v10, %v831_v8  ;;  %v713_v8 = vld [vmem:[#allocation6 + $0x2d8] sm:$0xff] }
  0x9d   : > { %4028 = vmatpush3.bf16.msra.mxu0 %v4025_v17 }
  0x9e   : > { %4030 = vmatprep.subr.bf16.mxu0 %v4029_v23 }
  0xa1   : > { %4032 = vmatpush3.bf16.msra.mxu0 %v4029_v23  ;;  %v517_v23 = vld [vmem:[#allocation6 + $0x198] sm:$0xff] }
  0xa2   : > { %4034 = vmatprep.subr.bf16.mxu0 %v4033_v26 }
  0xa5   : > { %4036 = vmatpush3.bf16.msra.mxu0 %v4033_v26  ;;  %v4089_v26 = vpack.c.bf16 %v517_v23, %v516_v21  ;;  %v833_v23 = vld [vmem:[#allocation6 + $0x3d0] sm:$0xff] }
  0xa6   : > { %4038 = vmatprep.subr.bf16.mxu0 %v4037_v29 }
  0xa9   : > { %4040 = vmatpush3.bf16.msra.mxu0 %v4037_v29  ;;  %v4093_v29 = vpack.c.bf16 %v519_v28, %v518_v27  ;;  %v836_v27 = vld [vmem:[#allocation6 + $0x3e8] sm:$0xff] }
  0xaa   : > { %4042 = vmatprep.subr.bf16.mxu0 %v4041_v32 }
  0xad   : > { %4044 = vmatpush3.bf16.msra.mxu0 %v4041_v32 }
  0xae   : > { %4046 = vmatprep.subr.bf16.mxu0 %v4045_v36 }
  0xb1   : > { %4048 = vmatpush3.bf16.msra.mxu0 %v4045_v36  ;;  %v523_v36 = vld [vmem:[#allocation6 + $0x1c8] sm:$0xff] }
  0xb2   : > { %4050 = vmatprep.subr.bf16.mxu0 %v4049_v40  ;;  %v4101_v37 = vpack.c.bf16 %v523_v36, %v522_v35  ;;  %v1121_v36 = vld [vmem:[#allocation6 + $0x500] sm:$0xff] }
  0xb5   : > { %4052 = vmatpush3.bf16.msra.mxu0 %v4049_v40  ;;  %v525_v40 = vld [vmem:[#allocation6 + $0x1d8] sm:$0xff] }
  0xb6   : > { %4150 = vmatprep.subr.bf16.mxu0 %v4149_v61 }
  0xb8   : > { %3220 = vmatmul.mubr.f32.vlgmr.msra.gmra.mrb[0].mxu0 %v403_v41  ;;  %v4105_v41 = vpack.c.bf16 %v525_v40, %v524_v38  ;;  %v1123_v38 = vld [vmem:[#allocation6 + $0x510] sm:$0xff] }
  0xb9   : > { %4152 = vmatpush3.bf16.msra.mxu0 %v4149_v61 }
  0xba   : > { %4154 = vmatprep.subr.bf16.mxu0 %v4153_v63 }
  0xbd   : > { %4156 = vmatpush3.bf16.msra.mxu0 %v4153_v63  ;;  %v708_v63 = vld [vmem:[#allocation6 + $0x2b0] sm:$0xff] }
  0xbe   : > { %4158 = vmatprep.subr.bf16.mxu0 %v4157_v2  ;;  %v4129_v1 = vpack.c.bf16 %v709_v0, %v708_v63 }
  0xc1   : > { %4160 = vmatpush3.bf16.msra.mxu0 %v4157_v2  ;;  %v710_v2 = vld [vmem:[#allocation6 + $0x2c0] sm:$0xff] }
  0xc2   : > { %4162 = vmatprep.subr.bf16.mxu0 %v4161_v7  ;;  %v4133_v5 = vpack.c.bf16 %v711_v3, %v710_v2  ;;  %v809_v2 = vld [vmem:[#allocation6 + $0x328] sm:$0xff]  ;;  %v811_v3 = vld [vmem:[#allocation6 + $0x338] sm:$0xff] }
  0xc5   : > { %4164 = vmatpush3.bf16.msra.mxu0 %v4161_v7  ;;  %v712_v7 = vld [vmem:[#allocation6 + $0x2d0] sm:$0xff] }
  0xc6   : > { %4166 = vmatprep.subr.bf16.mxu0 %v4165_v11  ;;  %v4137_v10 = vpack.c.bf16 %v713_v8, %v712_v7  ;;  %v812_v8 = vld [vmem:[#allocation6 + $0x340] sm:$0xff] }
  0xc9   : > { %4168 = vmatpush3.bf16.msra.mxu0 %v4165_v11  ;;  %v714_v11 = vld [vmem:[#allocation6 + $0x2e0] sm:$0xff] }
 0x18b   : > { %v3221_v14 = vpop.f32.mrb[0].mxu0 }
 0x18c   : > { %v506_v17 = vadd.f32 %v3221_v14, %v2665_v12  ;;  %v487_v18 = vpop.f32.mrb[1].mxu0 }
 0x18d   : > { %v505_v20 = vadd.f32 %v2665_v12, %v487_v18  ;;  %v715_v12 = vld [vmem:[#allocation6 + $0x2e8] sm:$0xff]  ;;  %v717_v18 = vld [vmem:[#allocation6 + $0x2f8] sm:$0xff] }
 0x18e   : > { %v508_v24 = vmax.f32 %v506_v17, 0.0  ;;  %v4141_v14 = vpack.c.bf16 %v715_v12, %v714_v11  ;;  %v716_v17 = vld [vmem:[#allocation6 + $0x2f0] sm:$0xff] }
 0x18f   : > { %v507_v25 = vmax.f32 %v505_v20, 0.0  ;;  %v4145_v20 = vpack.c.bf16 %v717_v18, %v716_v17  ;;  %v814_v12 = vld [vmem:[#allocation6 + $0x350] sm:$0xff]  ;;  %v816_v18 = vld [vmem:[#allocation6 + $0x360] sm:$0xff] }
 0x190   : > { %510 = vst [vmem:[#allocation2 + $0x9] sm:$0xff] %v508_v24 }
 0x191   : > { %509 = vst [vmem:[#allocation2 + $0x1] sm:$0xff] %v507_v25  ;;  %3254 = vmatprep.mubr.f32.mxu1 %v507_v25 }
 0x192   : > { %3255 = vmatmul.mubr.f32.vlgmr.msra.gmra.mrb[0].mxu1 %v508_v24  ;;  %v834_v24 = vld [vmem:[#allocation6 + $0x3d8] sm:$0xff] }
 0x193   : > { %4088 = vmatpush3.bf16.msra.mxu1 %v4085_v57  ;;  %v4121_v57 = vpack.c.bf16 %v705_v55, %v704_v54  ;;  %v4169_v25 = vpack.c.bf16 %v834_v24, %v833_v23  ;;  %v818_v23 = vld [vmem:[#allocation6 + $0x370] sm:$0xff]  ;;  %v819_v24 = vld [vmem:[#allocation6 + $0x378] sm:$0xff] }
 0x194   : > { %4090 = vmatprep.subr.bf16.mxu1 %v4089_v26 }
 0x195   : > { %4170 = vmatprep.subr.bf16.mxu0 %v4169_v25 }
 0x196   : > { %4172 = vmatpush3.bf16.msra.mxu0 %v4169_v25  ;;  %v4209_v25 = vpack.c.bf16 %v819_v24, %v818_v23 }
 0x197   : > { %4092 = vmatpush3.bf16.msra.mxu1 %v4089_v26  ;;  %v700_v21 = vld [vmem:[#allocation2 + $0xa] sm:$0xff]  ;;  %v835_v26 = vld [vmem:[#allocation6 + $0x3e0] sm:$0xff] }
 0x198   : > { %v511_v32 = vld [vmem:[#allocation2] sm:$0xff]  ;;  %4094 = vmatprep.subr.bf16.mxu1 %v4093_v29  ;;  %v512_v58 = vld [vmem:[#allocation2 + $0x8] sm:$0xff]  ;;  %v4173_v28 = vpack.c.bf16 %v836_v27, %v835_v26  ;;  %v992_v26 = vld [vmem:[#allocation6 + $0x400] sm:$0xff] }
 0x199   : > { %3289 = vmatprep.mubr.f32.mxu1 %v511_v32  ;;  %v699_v61 = vld [vmem:[#allocation2 + $0x2] sm:$0xff]  ;;  %v804_v32 = vld [vmem:[#allocation6 + $0x300] sm:$0xff] }
 0x19a   : > { %4174 = vmatprep.subr.bf16.mxu0 %v4173_v28  ;;  %v993_v27 = vld [vmem:[#allocation6 + $0x408] sm:$0xff] }
 0x19b   : > { %4096 = vmatpush3.bf16.msra.mxu1 %v4093_v29  ;;  %4176 = vmatpush3.bf16.msra.mxu0 %v4173_v28  ;;  %v837_v29 = vld [vmem:[#allocation6 + $0x3f0] sm:$0xff]  ;;  %v4213_v28 = vpack.c.bf16 %v993_v27, %v992_v26 }
 0x19c   : > { %4098 = vmatprep.subr.bf16.mxu1 %v4097_v34  ;;  %v4177_v31 = vpack.c.bf16 %v838_v30, %v837_v29  ;;  %v994_v29 = vld [vmem:[#allocation6 + $0x410] sm:$0xff]  ;;  %v995_v30 = vld [vmem:[#allocation6 + $0x418] sm:$0xff] }
 0x19d   : > { %v1104_v27 = vld [vmem:[#allocation6 + $0x490] sm:$0xff] }
 0x19e   : > { %4178 = vmatprep.subr.bf16.mxu0 %v4177_v31 }
 0x19f   : > { %4100 = vmatpush3.bf16.msra.mxu1 %v4097_v34  ;;  %4180 = vmatpush3.bf16.msra.mxu0 %v4177_v31  ;;  %v805_v34 = vld [vmem:[#allocation6 + $0x308] sm:$0xff]  ;;  %v4217_v31 = vpack.c.bf16 %v995_v30, %v994_v29 }
 0x1a0   : > { %4102 = vmatprep.subr.bf16.mxu1 %v4101_v37  ;;  %v4181_v35 = vpack.c.bf16 %v805_v34, %v804_v32  ;;  %v996_v34 = vld [vmem:[#allocation6 + $0x420] sm:$0xff] }
 0x1a2   : > { %4182 = vmatprep.subr.bf16.mxu0 %v4181_v35 }
 0x1a3   : > { %4104 = vmatpush3.bf16.msra.mxu1 %v4101_v37  ;;  %v1122_v37 = vld [vmem:[#allocation6 + $0x508] sm:$0xff] }
 0x1a4   : > { %4106 = vmatprep.subr.bf16.mxu1 %v4105_v41  ;;  %v4245_v40 = vpack.c.bf16 %v1122_v37, %v1121_v36 }
 0x1a7   : > { %4108 = vmatpush3.bf16.msra.mxu1 %v4105_v41  ;;  %v1124_v41 = vld [vmem:[#allocation6 + $0x518] sm:$0xff] }
 0x1a8   : > { %4110 = vmatprep.subr.bf16.mxu1 %v4109_v44  ;;  %v4249_v42 = vpack.c.bf16 %v1124_v41, %v1123_v38  ;;  %v998_v38 = vld [vmem:[#allocation6 + $0x430] sm:$0xff] }
 0x1ab   : > { %4112 = vmatpush3.bf16.msra.mxu1 %v4109_v44  ;;  %v1126_v44 = vld [vmem:[#allocation6 + $0x528] sm:$0xff] }
 0x1ac   : > { %4114 = vmatprep.subr.bf16.mxu1 %v4113_v48  ;;  %v4253_v46 = vpack.c.bf16 %v1126_v44, %v1125_v43  ;;  %v1001_v43 = vld [vmem:[#allocation6 + $0x448] sm:$0xff] }
 0x1af   : > { %4116 = vmatpush3.bf16.msra.mxu1 %v4113_v48  ;;  %v1128_v48 = vld [vmem:[#allocation6 + $0x538] sm:$0xff] }
 0x1b0   : > { %4118 = vmatprep.subr.bf16.mxu1 %v4117_v52  ;;  %v4257_v50 = vpack.c.bf16 %v1128_v48, %v1127_v47  ;;  %v1003_v47 = vld [vmem:[#allocation6 + $0x458] sm:$0xff] }
 0x1b2   : > { %3290 = vmatmul.mubr.f32.vlgmr.msra.gmra.mrb[0].mxu1 %v512_v58 }
 0x1b3   : > { %4120 = vmatpush3.bf16.msra.mxu1 %v4117_v52  ;;  %3324 = vmatprep.mubr.f32.mxu1 %v699_v61  ;;  %v1130_v52 = vld [vmem:[#allocation6 + $0x548] sm:$0xff]  ;;  %v807_v61 = vld [vmem:[#allocation6 + $0x318] sm:$0xff] }
 0x1b4   : > { %4122 = vmatprep.subr.bf16.mxu1 %v4121_v57  ;;  %v4261_v54 = vpack.c.bf16 %v1130_v52, %v1129_v51  ;;  %v4185_v0 = vpack.c.bf16 %v807_v61, %v806_v60  ;;  %v1005_v51 = vld [vmem:[#allocation6 + $0x468] sm:$0xff]  ;;  %v1135_v61 = vld [vmem:[#allocation6 + $0x570] sm:$0xff] }
 0x1b7   : > { %4124 = vmatpush3.bf16.msra.mxu1 %v4121_v57 }
 0x1b8   : > { %4126 = vmatprep.subr.bf16.mxu1 %v4125_v62 }
 0x1bb   : > { %4128 = vmatpush3.bf16.msra.mxu1 %v4125_v62 }
 0x1bc   : > { %4130 = vmatprep.subr.bf16.mxu1 %v4129_v1 }
 0x1bf   : > { %4132 = vmatpush3.bf16.msra.mxu1 %v4129_v1  ;;  %v808_v1 = vld [vmem:[#allocation6 + $0x320] sm:$0xff] }
 0x1c0   : > { %4134 = vmatprep.subr.bf16.mxu1 %v4133_v5 }
 0x1c3   : > { %4136 = vmatpush3.bf16.msra.mxu1 %v4133_v5 }
 0x1c4   : > { %4138 = vmatprep.subr.bf16.mxu1 %v4137_v10 }
 0x1c7   : > { %4140 = vmatpush3.bf16.msra.mxu1 %v4137_v10  ;;  %v813_v10 = vld [vmem:[#allocation6 + $0x348] sm:$0xff] }
 0x1c8   : > { %4142 = vmatprep.subr.bf16.mxu1 %v4141_v14  ;;  %v4197_v11 = vpack.c.bf16 %v813_v10, %v812_v8  ;;  %v1409_v10 = vld [vmem:[#allocation6 + $0x68] sm:$0xff] }
 0x1cb   : > { %4144 = vmatpush3.bf16.msra.mxu1 %v4141_v14  ;;  %v815_v14 = vld [vmem:[#allocation6 + $0x358] sm:$0xff] }
 0x1cc   : > { %4146 = vmatprep.subr.bf16.mxu1 %v4145_v20  ;;  %v4201_v17 = vpack.c.bf16 %v815_v14, %v814_v12  ;;  %v1410_v12 = vld [vmem:[#allocation6 + $0x70] sm:$0xff]  ;;  %v1411_v14 = vld [vmem:[#allocation6 + $0x78] sm:$0xff] }
 0x1cf   : > { %4148 = vmatpush3.bf16.msra.mxu1 %v4145_v20  ;;  %v817_v20 = vld [vmem:[#allocation6 + $0x368] sm:$0xff] }
 0x1d0   : > { %4246 = vmatprep.subr.bf16.mxu1 %v4245_v40 }
 0x1d2   : > { %3325 = vmatmul.mubr.f32.vlgmr.msra.gmra.mrb[0].mxu1 %v700_v21  ;;  %v4205_v21 = vpack.c.bf16 %v817_v20, %v816_v18  ;;  %v1582_v18 = vld [vmem:[#allocation6 + $0x100] sm:$0xff] }
 0x1d3   : > { %4248 = vmatpush3.bf16.msra.mxu1 %v4245_v40  ;;  %v999_v40 = vld [vmem:[#allocation6 + $0x438] sm:$0xff] }
 0x1d4   : > { %4250 = vmatprep.subr.bf16.mxu1 %v4249_v42  ;;  %v4225_v41 = vpack.c.bf16 %v999_v40, %v998_v38 }
 0x1d7   : > { %4252 = vmatpush3.bf16.msra.mxu1 %v4249_v42  ;;  %v1000_v42 = vld [vmem:[#allocation6 + $0x440] sm:$0xff] }
 0x1d8   : > { %4254 = vmatprep.subr.bf16.mxu1 %v4253_v46  ;;  %v4229_v44 = vpack.c.bf16 %v1001_v43, %v1000_v42 }
 0x1db   : > { %4256 = vmatpush3.bf16.msra.mxu1 %v4253_v46  ;;  %v1002_v46 = vld [vmem:[#allocation6 + $0x450] sm:$0xff] }
 0x1dc   : > { %4258 = vmatprep.subr.bf16.mxu1 %v4257_v50  ;;  %v4233_v48 = vpack.c.bf16 %v1003_v47, %v1002_v46  ;;  %v1111_v46 = vld [vmem:[#allocation6 + $0x4c8] sm:$0xff] }
 0x1df   : > { %4260 = vmatpush3.bf16.msra.mxu1 %v4257_v50  ;;  %v1004_v50 = vld [vmem:[#allocation6 + $0x460] sm:$0xff] }
 0x1e0   : > { %4262 = vmatprep.subr.bf16.mxu1 %v4261_v54  ;;  %v4237_v52 = vpack.c.bf16 %v1005_v51, %v1004_v50  ;;  %v1113_v50 = vld [vmem:[#allocation6 + $0x4d8] sm:$0xff]  ;;  %v1584_v51 = vld [vmem:[#allocation6 + $0x110] sm:$0xff] }
 0x1e3   : > { %4264 = vmatpush3.bf16.msra.mxu1 %v4261_v54  ;;  %v1006_v54 = vld [vmem:[#allocation6 + $0x470] sm:$0xff] }
 0x2a5   : > { %v3326_v55 = vpop.f32.mrb[0].mxu1 }
 0x2a6   : > { %v796_v57 = vadd.f32 %v3326_v55, %v5151_v15  ;;  %v784_v58 = vpop.f32.mrb[1].mxu1  ;;  %v810_v15 = vld [vmem:[#allocation6 + $0x330] sm:$0xff]  ;;  %v1007_v55 = vld [vmem:[#allocation6 + $0x478] sm:$0xff] }
 0x2a7   : > { %v795_v59 = vadd.f32 %v784_v58, %v5148_v13  ;;  %v4189_v13 = vpack.c.bf16 %v809_v2, %v808_v1  ;;  %v4193_v7 = vpack.c.bf16 %v811_v3, %v810_v15  ;;  %v1103_v2 = vld [vmem:[#allocation6 + $0x488] sm:$0xff]  ;;  %v1404_v15 = vld [vmem:[#allocation6 + $0x40] sm:$0xff] }
 0x2a8   : > { %v5201_v62 = vmax.f32 %v796_v57, 0.0  ;;  %v4241_v57 = vpack.c.bf16 %v1007_v55, %v1006_v54  ;;  %v1405_v3 = vld [vmem:[#allocation6 + $0x48] sm:$0xff]  ;;  %v1114_v55 = vld [vmem:[#allocation6 + $0x4e0] sm:$0xff] }
 0x2a9   : > { %v5203_v63 = vmax.f32 %v795_v59, 0.0  ;;  %v1132_v59 = vld [vmem:[#allocation6 + $0x558] sm:$0xff] }
 0x2aa   : > { %800 = vst [vmem:[#allocation2 + $0x9] sm:$0xff] %v5201_v62 }
 0x2ab   : > { %799 = vst [vmem:[#allocation2 + $0x1] sm:$0xff] %v5203_v63  ;;  %3359 = vmatprep.mubr.f32.mxu0 %v5203_v63 }
 0x2ac   : > { %3360 = vmatmul.mubr.f32.vlgmr.msra.gmra.mrb[2].mxu0 %v5201_v62 }
 0x2ad   : > { %4184 = vmatpush3.bf16.msra.mxu0 %v4181_v35  ;;  %v997_v35 = vld [vmem:[#allocation6 + $0x428] sm:$0xff] }
 0x2ae   : > { %4186 = vmatprep.subr.bf16.mxu0 %v4185_v0  ;;  %v4221_v37 = vpack.c.bf16 %v997_v35, %v996_v34  ;;  %v1107_v34 = vld [vmem:[#allocation6 + $0x4a8] sm:$0xff] }
 0x2b1   : > { %4188 = vmatpush3.bf16.msra.mxu0 %v4185_v0  ;;  %v990_v58 = vld [vmem:[#allocation2 + $0xa] sm:$0xff] }
 0x2b2   : > { %v801_v5 = vld [vmem:[#allocation2] sm:$0xff]  ;;  %4190 = vmatprep.subr.bf16.mxu0 %v4189_v13  ;;  %v802_v32 = vld [vmem:[#allocation2 + $0x8] sm:$0xff]  ;;  %v1136_v0 = vld [vmem:[#allocation6 + $0x578] sm:$0xff] }
 0x2b3   : > { %3394 = vmatprep.mubr.f32.mxu0 %v801_v5  ;;  %v989_v36 = vld [vmem:[#allocation2 + $0x2] sm:$0xff]  ;;  %v4273_v1 = vpack.c.bf16 %v1136_v0, %v1135_v61  ;;  %v1117_v61 = vld [vmem:[#allocation6 + $0x4f8] sm:$0xff] }
 0x2b4   : > { %v1406_v5 = vld [vmem:[#allocation6 + $0x50] sm:$0xff] }
 0x2b5   : > { %4192 = vmatpush3.bf16.msra.mxu0 %v4189_v13  ;;  %v1588_v0 = vld [vmem:[#allocation6 + $0x130] sm:$0xff] }
 0x2b6   : > { %4194 = vmatprep.subr.bf16.mxu0 %v4193_v7 }
 0x2b9   : > { %4196 = vmatpush3.bf16.msra.mxu0 %v4193_v7  ;;  %v1407_v7 = vld [vmem:[#allocation6 + $0x58] sm:$0xff] }
 0x2ba   : > { %4198 = vmatprep.subr.bf16.mxu0 %v4197_v11  ;;  %v4393_v8 = vpack.c.bf16 %v1407_v7, %v1406_v5 }
 0x2bd   : > { %4200 = vmatpush3.bf16.msra.mxu0 %v4197_v11 }
 0x2be   : > { %4202 = vmatprep.subr.bf16.mxu0 %v4201_v17 }
 0x2c1   : > { %4204 = vmatpush3.bf16.msra.mxu0 %v4201_v17  ;;  %v4401_v17 = vpack.c.bf16 %v1411_v14, %v1410_v12  ;;  %v1294_v14 = vld [vmem:[#allocation6 + $0x5a0] sm:$0xff] }
 0x2c2   : > { %4206 = vmatprep.subr.bf16.mxu0 %v4205_v21 }
 0x2c5   : > { %4208 = vmatpush3.bf16.msra.mxu0 %v4205_v21  ;;  %v2667_v21 = vld [vmem:[%s5414_s2 + $0x1] ss:$0 sm:$0xff] }
 0x2c6   : > { %4210 = vmatprep.subr.bf16.mxu0 %v4209_v25 }
 0x2c9   : > { %4212 = vmatpush3.bf16.msra.mxu0 %v4209_v25 }
 0x2ca   : > { %4214 = vmatprep.subr.bf16.mxu0 %v4213_v28 }
 0x2cc   : > { %3395 = vmatmul.mubr.f32.vlgmr.msra.gmra.mrb[2].mxu0 %v802_v32  ;;  %v1106_v32 = vld [vmem:[#allocation6 + $0x4a0] sm:$0xff] }
 0x2cd   : > { %4216 = vmatpush3.bf16.msra.mxu0 %v4213_v28  ;;  %3429 = vmatprep.mubr.f32.mxu0 %v989_v36  ;;  %v1105_v28 = vld [vmem:[#allocation6 + $0x498] sm:$0xff]  ;;  %v4285_v35 = vpack.c.bf16 %v1107_v34, %v1106_v32  ;;  %v1108_v36 = vld [vmem:[#allocation6 + $0x4b0] sm:$0xff] }
 0x2ce   : > { %4218 = vmatprep.subr.bf16.mxu0 %v4217_v31  ;;  %v1300_v34 = vld [vmem:[#allocation6 + $0x5d0] sm:$0xff] }
 0x2d1   : > { %4220 = vmatpush3.bf16.msra.mxu0 %v4217_v31  ;;  %v4281_v31 = vpack.c.bf16 %v1105_v28, %v1104_v27  ;;  %v1597_v27 = vld [vmem:[#allocation6 + $0x178] sm:$0xff] }
 0x2d2   : > { %4222 = vmatprep.subr.bf16.mxu0 %v4221_v37 }
 0x2d5   : > { %4224 = vmatpush3.bf16.msra.mxu0 %v4221_v37  ;;  %v1109_v37 = vld [vmem:[#allocation6 + $0x4b8] sm:$0xff] }
 0x2d6   : > { %4226 = vmatprep.subr.bf16.mxu0 %v4225_v41  ;;  %v5250_v43 = vpack.c.bf16 %v1109_v37, %v1108_v36 }
 0x2d9   : > { %4228 = vmatpush3.bf16.msra.mxu0 %v4225_v41 }
 0x2da   : > { %4230 = vmatprep.subr.bf16.mxu0 %v4229_v44 }
 0x2dd   : > { %4232 = vmatpush3.bf16.msra.mxu0 %v4229_v44  ;;  %v1110_v44 = vld [vmem:[#allocation6 + $0x4c0] sm:$0xff] }
 0x2de   : > { %4234 = vmatprep.subr.bf16.mxu0 %v4233_v48  ;;  %v5255_v47 = vpack.c.bf16 %v1111_v46, %v1110_v44  ;;  %v1304_v44 = vld [vmem:[#allocation6 + $0x5f0] sm:$0xff]  ;;  %v1305_v46 = vld [vmem:[#allocation6 + $0x5f8] sm:$0xff] }
 0x2e1   : > { %4236 = vmatpush3.bf16.msra.mxu0 %v4233_v48  ;;  %v1112_v48 = vld [vmem:[#allocation6 + $0x4d0] sm:$0xff] }
 0x2e2   : > { %4238 = vmatprep.subr.bf16.mxu0 %v4237_v52  ;;  %v5259_v54 = vpack.c.bf16 %v1113_v50, %v1112_v48  ;;  %v5301_v48 = vpack.c.bf16 %v1305_v46, %v1304_v44  ;;  %v1708_v50 = vld [vmem:[#allocation6 + $0x200] sm:$0xff] }
 0x2e5   : > { %4240 = vmatpush3.bf16.msra.mxu0 %v4237_v52  ;;  %v1585_v52 = vld [vmem:[#allocation6 + $0x118] sm:$0xff] }
 0x2e6   : > { %4242 = vmatprep.subr.bf16.mxu0 %v4241_v57 }
 0x2e9   : > { %4244 = vmatpush3.bf16.msra.mxu0 %v4241_v57 }
 0x2ea   : > { %4342 = vmatprep.subr.bf16.mxu0 %v5138_v4 }
 0x2ec   : > { %3430 = vmatmul.mubr.f32.vlgmr.msra.gmra.mrb[2].mxu0 %v990_v58 }
 0x2ed   : > { %4344 = vmatpush3.bf16.msra.mxu0 %v5138_v4  ;;  %v2668_v4 = vld [vmem:[%s5128_s26 + $0x10] sm:$0xff] }
 0x2ee   : > { %4346 = vmatprep.subr.bf16.mxu0 %v5140_v6 }
 0x2f1   : > { %4348 = vmatpush3.bf16.msra.mxu0 %v5140_v6  ;;  %v5227_v6 = vmax.f32 %v2668_v4, 0.0  ;;  %v4409_v4 = vpack.c.bf16 %v1585_v52, %v1584_v51  ;;  %v1709_v51 = vld [vmem:[#allocation6 + $0x208] sm:$0xff] }
 0x2f2   : > { %4350 = vmatprep.subr.bf16.mxu0 %v5145_v9  ;;  %v4437_v52 = vpack.c.bf16 %v1709_v51, %v1708_v50  ;;  %v1692_v50 = vld [vmem:[#allocation6 + $0x190] sm:$0xff]  ;;  %v1693_v51 = vld [vmem:[#allocation6 + $0x198] sm:$0xff] }
 0x2f3   : > { %3569 = vmatprep.mubr.f32.mxu0 %v5227_v6 }
 0x2f5   : > { %4352 = vmatpush3.bf16.msra.mxu0 %v5145_v9  ;;  %v2669_v9 = vld [vmem:[%s5128_s26 + $0x18] sm:$0xff]  ;;  %s4881_s26 = sshll.u32 %s4954_s10, 4  ;;  %s4882_s26 = int_to_ptr.vmem [resolvable:$false] %s4881_s26 }
 0x2f6   : > { %4354 = vmatprep.subr.bf16.mxu0 %v5157_v16  ;;  %s4883_s18 = scalar_lea.vmem %s4882_s26, 1024  ;;  %p4884_p10 = scmp.lt.s32.totalorder %s5359_s28, %s4882_s26 }
 0x2f7   : > { %p4885_p13 = scmp.lt.s32.totalorder %s4883_s18, %s4877_s16 }
 0x2f9   : > { %4356 = vmatpush3.bf16.msra.mxu0 %v5157_v16  ;;  %v5230_v16 = vmax.f32 %v2669_v9, 0.0  ;;  %v1115_v9 = vld [vmem:[#allocation6 + $0x4e8] sm:$0xff]  ;;  %p4886_p3 = por %p4885_p13, %p4884_p10 }
 0x2fa   : > { %4358 = vmatprep.subr.bf16.mxu0 %v5162_v19 }
 0x2fb   : > { %p4887_p7 = pnand %p4886_p3, %p4880_p8 }
 0x2fd   : > { %4360 = vmatpush3.bf16.msra.mxu0 %v5162_v19  ;;  %v1131_v19 = vld [vmem:[#allocation6 + $0x550] sm:$0xff] }
 0x2fe   : > { %4362 = vmatprep.subr.bf16.mxu0 %v5166_v22 }
 0x301   : > { %4364 = vmatpush3.bf16.msra.mxu0 %v5166_v22  ;;  %v4265_v22 = vpack.c.bf16 %v1132_v59, %v1131_v19  ;;  %v1586_v19 = vld [vmem:[#allocation6 + $0x120] sm:$0xff]  ;;  %v1587_v59 = vld [vmem:[#allocation6 + $0x128] sm:$0xff] }
 0x302   : > { %4366 = vmatprep.subr.bf16.mxu0 %v5170_v33 }
 0x303   : > { %4266 = vmatprep.subr.bf16.mxu1 %v4265_v22 }
 0x304   : > { %4268 = vmatpush3.bf16.msra.mxu1 %v4265_v22 }
 0x305   : > { %4368 = vmatpush3.bf16.msra.mxu0 %v5170_v33  ;;  %v1133_v33 = vld [vmem:[#allocation6 + $0x560] sm:$0xff] }
 0x306   : > { %4370 = vmatprep.subr.bf16.mxu0 %v5174_v39 }
 0x309   : > { %4372 = vmatpush3.bf16.msra.mxu0 %v5174_v39  ;;  %v1134_v39 = vld [vmem:[#allocation6 + $0x568] sm:$0xff] }
 0x30a   : > { %4374 = vmatprep.subr.bf16.mxu0 %v5178_v45  ;;  %v4269_v60 = vpack.c.bf16 %v1134_v39, %v1133_v33  ;;  %v5263_v33 = vpack.c.bf16 %v1115_v9, %v1114_v55  ;;  %v1116_v39 = vld [vmem:[#allocation6 + $0x4f0] sm:$0xff]  ;;  %v1713_v9 = vld [vmem:[#allocation6 + $0x228] sm:$0xff] }
 0x30b   : > { %v1710_v55 = vld [vmem:[#allocation6 + $0x210] sm:$0xff] }
 0x30c   : > { %3570 = vmatmul.mubr.f32.vlgmr.msra.gmra.mrb[4].mxu0 %v5230_v16  ;;  %4270 = vmatprep.subr.bf16.mxu1 %v4269_v60 }
 0x30d   : > { %4376 = vmatpush3.bf16.msra.mxu0 %v5178_v45  ;;  %4272 = vmatpush3.bf16.msra.mxu1 %v4269_v60  ;;  %v1102_v45 = vld [vmem:[#allocation6 + $0x480] sm:$0xff]  ;;  %v4413_v60 = vpack.c.bf16 %v1587_v59, %v1586_v19  ;;  %v1714_v59 = vld [vmem:[#allocation6 + $0x230] sm:$0xff] }
 0x30e   : > { %4378 = vmatprep.subr.bf16.mxu0 %v5182_v49  ;;  %4274 = vmatprep.subr.bf16.mxu1 %v4273_v1  ;;  %v4277_v13 = vpack.c.bf16 %v1103_v2, %v1102_v45  ;;  %v5267_v45 = vpack.c.bf16 %v1117_v61, %v1116_v39  ;;  %v1290_v2 = vld [vmem:[#allocation6 + $0x580] sm:$0xff]  ;;  %v1717_v61 = vld [vmem:[#allocation6 + $0x248] sm:$0xff] }
 0x311   : > { %4380 = vmatpush3.bf16.msra.mxu0 %v5182_v49  ;;  %4276 = vmatpush3.bf16.msra.mxu1 %v4273_v1  ;;  %v4389_v49 = vpack.c.bf16 %v1405_v3, %v1404_v15  ;;  %v1589_v1 = vld [vmem:[#allocation6 + $0x138] sm:$0xff]  ;;  %v1291_v15 = vld [vmem:[#allocation6 + $0x588] sm:$0xff]  ;;  %v1590_v3 = vld [vmem:[#allocation6 + $0x140] sm:$0xff] }
 0x312   : > { %4382 = vmatprep.subr.bf16.mxu0 %v5187_v53  ;;  %4278 = vmatprep.subr.bf16.mxu1 %v4277_v13  ;;  %v5271_v5 = vpack.c.bf16 %v1291_v15, %v1290_v2  ;;  %v1719_v2 = vld [vmem:[#allocation6 + $0x258] sm:$0xff]  ;;  %v1721_v15 = vld [vmem:[#allocation6 + $0x268] sm:$0xff] }
 0x315   : > { %4384 = vmatpush3.bf16.msra.mxu0 %v5187_v53  ;;  %v1408_v53 = vld [vmem:[#allocation6 + $0x60] sm:$0xff] }
 0x316   : > { %4386 = vmatprep.subr.bf16.mxu0 %v5191_v56  ;;  %v4397_v11 = vpack.c.bf16 %v1409_v10, %v1408_v53  ;;  %v1293_v53 = vld [vmem:[#allocation6 + $0x598] sm:$0xff]  ;;  %v1592_v10 = vld [vmem:[#allocation6 + $0x150] sm:$0xff] }
 0x319   : > { %4388 = vmatpush3.bf16.msra.mxu0 %v5191_v56  ;;  %v1583_v56 = vld [vmem:[#allocation6 + $0x108] sm:$0xff] }
 0x31a   : > { %4390 = vmatprep.subr.bf16.mxu0 %v4389_v49  ;;  %v4405_v20 = vpack.c.bf16 %v1583_v56, %v1582_v18  ;;  %v1594_v56 = vld [vmem:[#allocation6 + $0x160] sm:$0xff] }
 0x31d   : > { %4392 = vmatpush3.bf16.msra.mxu0 %v4389_v49  ;;  %v1591_v49 = vld [vmem:[#allocation6 + $0x148] sm:$0xff] }
 0x31e   : > { %4394 = vmatprep.subr.bf16.mxu0 %v4393_v8  ;;  %v4421_v7 = vpack.c.bf16 %v1591_v49, %v1590_v3  ;;  %v1722_v49 = vld [vmem:[#allocation6 + $0x270] sm:$0xff] }
 0x321   : > { %4396 = vmatpush3.bf16.msra.mxu0 %v4393_v8  ;;  %v1292_v8 = vld [vmem:[#allocation6 + $0x590] sm:$0xff] }
 0x322   : > { %4398 = vmatprep.subr.bf16.mxu0 %v4397_v11  ;;  %v5275_v12 = vpack.c.bf16 %v1293_v53, %v1292_v8  ;;  %v1690_v53 = vld [vmem:[#allocation6 + $0x180] sm:$0xff] }
 0x325   : > { %4400 = vmatpush3.bf16.msra.mxu0 %v4397_v11  ;;  %v1593_v11 = vld [vmem:[#allocation6 + $0x158] sm:$0xff] }
 0x326   : > { %4402 = vmatprep.subr.bf16.mxu0 %v4401_v17  ;;  %v4425_v18 = vpack.c.bf16 %v1593_v11, %v1592_v10  ;;  %v1691_v10 = vld [vmem:[#allocation6 + $0x188] sm:$0xff] }
 0x327   : > { %v4469_v11 = vpack.c.bf16 %v1691_v10, %v1690_v53  ;;  %v1705_v53 = vld [vmem:[#allocation6 + $0x1f8] sm:$0xff] }
 0x329   : > { %4404 = vmatpush3.bf16.msra.mxu0 %v4401_v17  ;;  %v1295_v17 = vld [vmem:[#allocation6 + $0x5a8] sm:$0xff] }
 0x32a   : > { %4406 = vmatprep.subr.bf16.mxu0 %v4405_v20 }
 0x3bf   : > { %v3431_v23 = vpop.f32.mrb[2].mxu0 }
 0x3c0   : > { %v1094_v24 = vadd.f32 %v3431_v23, %v2667_v21  ;;  %v1074_v25 = vpop.f32.mrb[3].mxu0  ;;  %v1296_v23 = vld [vmem:[#allocation6 + $0x5b0] sm:$0xff] }
 0x3c1   : > { %v1093_v26 = vadd.f32 %v2667_v21, %v1074_v25  ;;  %v5281_v21 = vpack.c.bf16 %v1295_v17, %v1294_v14  ;;  %v1995_v14 = vld [vmem:[#allocation6 + $0x380] sm:$0xff]  ;;  %v1996_v17 = vld [vmem:[#allocation6 + $0x388] sm:$0xff] }
 0x3c2   : > { %v1096_v29 = vmax.f32 %v1094_v24, 0.0  ;;  %v1297_v24 = vld [vmem:[#allocation6 + $0x5b8] sm:$0xff] }
 0x3c3   : > { %v1095_v30 = vmax.f32 %v1093_v26, 0.0  ;;  %v1596_v26 = vld [vmem:[#allocation6 + $0x170] sm:$0xff]  ;;  %v5285_v28 = vpack.c.bf16 %v1297_v24, %v1296_v23  ;;  %v1999_v24 = vld [vmem:[#allocation6 + $0x3a0] sm:$0xff] }
 0x3c4   : > { %1098 = vst [vmem:[#allocation2 + $0x9] sm:$0xff] %v1096_v29 }
 0x3c5   : > { %1097 = vst [vmem:[#allocation2 + $0x1] sm:$0xff] %v1095_v30  ;;  %3464 = vmatprep.mubr.f32.mxu1 %v1095_v30  ;;  %v1299_v30 = vld [vmem:[#allocation6 + $0x5c8] sm:$0xff] }
 0x3c6   : > { %3465 = vmatmul.mubr.f32.vlgmr.msra.gmra.mrb[2].mxu1 %v1096_v29  ;;  %v1298_v29 = vld [vmem:[#allocation6 + $0x5c0] sm:$0xff] }
 0x3c7   : > { %4280 = vmatpush3.bf16.msra.mxu1 %v4277_v13  ;;  %v4417_v13 = vpack.c.bf16 %v1589_v1, %v1588_v0  ;;  %v5289_v32 = vpack.c.bf16 %v1299_v30, %v1298_v29  ;;  %v1718_v1 = vld [vmem:[#allocation6 + $0x250] sm:$0xff]  ;;  %v2002_v29 = vld [vmem:[#allocation6 + $0x3b8] sm:$0xff] }
 0x3c8   : > { %4282 = vmatprep.subr.bf16.mxu1 %v4281_v31 }
 0x3cb   : > { %v5244_v38 = vld [vmem:[#allocation2 + $0xa] sm:$0xff]  ;;  %4284 = vmatpush3.bf16.msra.mxu1 %v4281_v31  ;;  %v4433_v31 = vpack.c.bf16 %v1597_v27, %v1596_v26 }
 0x3cc   : > { %v5246_v40 = vld [vmem:[#allocation2 + $0x8] sm:$0xff]  ;;  %v1099_v42 = vld [vmem:[#allocation2] sm:$0xff]  ;;  %4286 = vmatprep.subr.bf16.mxu1 %v4285_v35 }
 0x3cd   : > { %v5248_v41 = vld [vmem:[#allocation2 + $0x2] sm:$0xff]  ;;  %3499 = vmatprep.mubr.f32.mxu1 %v1099_v42 }
 0x3ce   : > { %1392 = vst [vmem:[#allocation2 + $0x1] sm:$0xff] %v5227_v6  ;;  %1393 = vst [vmem:[#allocation2 + $0x9] sm:$0xff] %v5230_v16  ;;  %v2001_v27 = vld [vmem:[#allocation6 + $0x3b0] sm:$0xff] }
 0x3cf   : > { %4288 = vmatpush3.bf16.msra.mxu1 %v4285_v35  ;;  %v1301_v35 = vld [vmem:[#allocation6 + $0x5d8] sm:$0xff]  ;;  %v4545_v30 = vpack.c.bf16 %v2002_v29, %v2001_v27  ;;  %v1882_v29 = vld [vmem:[#allocation6 + $0x2b0] sm:$0xff] }
 0x3d0   : > { %4290 = vmatprep.subr.bf16.mxu1 %v5250_v43  ;;  %v5293_v36 = vpack.c.bf16 %v1301_v35, %v1300_v34  ;;  %v2004_v34 = vld [vmem:[#allocation6 + $0x3c8] sm:$0xff] }
 0x3d3   : > { %4292 = vmatpush3.bf16.msra.mxu1 %v5250_v43 }
 0x3d4   : > { %4294 = vmatprep.subr.bf16.mxu1 %v5255_v47 }
 0x3d5   : > { %v1394_v57 = vld [vmem:[#allocation2] sm:$0xff]  ;;  %v1395_v58 = vld [vmem:[#allocation2 + $0x8] sm:$0xff] }
 0x3d6   : > { %3604 = vmatprep.mubr.f32.mxu0 %v1394_v57  ;;  %v1580_v22 = vld [vmem:[#allocation2 + $0x2] sm:$0xff]  ;;  %v1581_v37 = vld [vmem:[#allocation2 + $0xa] sm:$0xff] }
 0x3d7   : > { %3605 = vmatmul.mubr.f32.vlgmr.msra.gmra.mrb[4].mxu0 %v1395_v58  ;;  %4296 = vmatpush3.bf16.msra.mxu1 %v5255_v47  ;;  %v1711_v57 = vld [vmem:[#allocation6 + $0x218] sm:$0xff] }
 0x3d8   : > { %4408 = vmatpush3.bf16.msra.mxu0 %v4405_v20  ;;  %4298 = vmatprep.subr.bf16.mxu1 %v5259_v54  ;;  %v1595_v20 = vld [vmem:[#allocation6 + $0x168] sm:$0xff]  ;;  %v4441_v58 = vpack.c.bf16 %v1711_v57, %v1710_v55  ;;  %v4473_v57 = vpack.c.bf16 %v1693_v51, %v1692_v50 }
 0x3d9   : > { %4410 = vmatprep.subr.bf16.mxu0 %v4409_v4  ;;  %3639 = vmatprep.mubr.f32.mxu0 %v1580_v22  ;;  %v4429_v25 = vpack.c.bf16 %v1595_v20, %v1594_v56  ;;  %v1715_v22 = vld [vmem:[#allocation6 + $0x238] sm:$0xff]  ;;  %v4533_v56 = vpack.c.bf16 %v1996_v17, %v1995_v14  ;;  %v1877_v14 = vld [vmem:[#allocation6 + $0x288] sm:$0xff] }
 0x3da   : > { %v4449_v39 = vpack.c.bf16 %v1715_v22, %v1714_v59  ;;  %v1998_v20 = vld [vmem:[#allocation6 + $0x398] sm:$0xff]  ;;  %v1889_v50 = vld [vmem:[#allocation6 + $0x2e8] sm:$0xff] }
 0x3db   : > { %4300 = vmatpush3.bf16.msra.mxu1 %v5259_v54  ;;  %v1697_v59 = vld [vmem:[#allocation6 + $0x1b8] sm:$0xff] }
 0x3dc   : > { %4412 = vmatpush3.bf16.msra.mxu0 %v4409_v4  ;;  %4302 = vmatprep.subr.bf16.mxu1 %v5263_v33  ;;  %v1712_v4 = vld [vmem:[#allocation6 + $0x220] sm:$0xff] }
 0x3dd   : > { %4414 = vmatprep.subr.bf16.mxu0 %v4413_v60  ;;  %v4445_v19 = vpack.c.bf16 %v1713_v9, %v1712_v4  ;;  %v1695_v4 = vld [vmem:[#allocation6 + $0x1a8] sm:$0xff] }
 0x3df   : > { %4304 = vmatpush3.bf16.msra.mxu1 %v5263_v33 }
 0x3e0   : > { %4416 = vmatpush3.bf16.msra.mxu0 %v4413_v60  ;;  %4306 = vmatprep.subr.bf16.mxu1 %v5267_v45  ;;  %v1716_v60 = vld [vmem:[#allocation6 + $0x240] sm:$0xff] }
 0x3e1   : > { %4418 = vmatprep.subr.bf16.mxu0 %v4417_v13  ;;  %v4453_v0 = vpack.c.bf16 %v1717_v61, %v1716_v60  ;;  %v1698_v60 = vld [vmem:[#allocation6 + $0x1c0] sm:$0xff]  ;;  %v1699_v61 = vld [vmem:[#allocation6 + $0x1c8] sm:$0xff] }
 0x3e3   : > { %4308 = vmatpush3.bf16.msra.mxu1 %v5267_v45 }
 0x3e4   : > { %4420 = vmatpush3.bf16.msra.mxu0 %v4417_v13  ;;  %4310 = vmatprep.subr.bf16.mxu1 %v5271_v5  ;;  %v4457_v13 = vpack.c.bf16 %v1719_v2, %v1718_v1 }
 0x3e5   : > { %4422 = vmatprep.subr.bf16.mxu0 %v4421_v7 }
 0x3e6   : > { %3500 = vmatmul.mubr.f32.vlgmr.msra.gmra.mrb[2].mxu1 %v5246_v40  ;;  %v1302_v40 = vld [vmem:[#allocation6 + $0x5e0] sm:$0xff] }
 0x3e7   : > { %4312 = vmatpush3.bf16.msra.mxu1 %v5271_v5  ;;  %3534 = vmatprep.mubr.f32.mxu1 %v5248_v41  ;;  %v1303_v41 = vld [vmem:[#allocation6 + $0x5e8] sm:$0xff] }
 0x3e8   : > { %4314 = vmatprep.subr.bf16.mxu1 %v5275_v12  ;;  %4424 = vmatpush3.bf16.msra.mxu0 %v4421_v7  ;;  %v5297_v42 = vpack.c.bf16 %v1303_v41, %v1302_v40  ;;  %v1723_v7 = vld [vmem:[#allocation6 + $0x278] sm:$0xff] }
 0x3e9   : > { %4426 = vmatprep.subr.bf16.mxu0 %v4425_v18  ;;  %v4465_v8 = vpack.c.bf16 %v1723_v7, %v1722_v49  ;;  %v1702_v7 = vld [vmem:[#allocation6 + $0x1e0] sm:$0xff] }
 0x3eb   : > { %4316 = vmatpush3.bf16.msra.mxu1 %v5275_v12 }
 0x3ec   : > { %4318 = vmatprep.subr.bf16.mxu1 %v5281_v21  ;;  %4428 = vmatpush3.bf16.msra.mxu0 %v4425_v18  ;;  %v1997_v18 = vld [vmem:[#allocation6 + $0x390] sm:$0xff] }
 0x3ed   : > { %4430 = vmatprep.subr.bf16.mxu0 %v4429_v25  ;;  %v4537_v23 = vpack.c.bf16 %v1998_v20, %v1997_v18  ;;  %v1878_v18 = vld [vmem:[#allocation6 + $0x290] sm:$0xff] }
 0x3ef   : > { %4320 = vmatpush3.bf16.msra.mxu1 %v5281_v21 }
 0x3f0   : > { %4322 = vmatprep.subr.bf16.mxu1 %v5285_v28  ;;  %4432 = vmatpush3.bf16.msra.mxu0 %v4429_v25  ;;  %v2000_v25 = vld [vmem:[#allocation6 + $0x3a8] sm:$0xff] }
 0x3f1   : > { %4434 = vmatprep.subr.bf16.mxu0 %v4433_v31  ;;  %v4541_v26 = vpack.c.bf16 %v2000_v25, %v1999_v24  ;;  %v1880_v24 = vld [vmem:[#allocation6 + $0x2a0] sm:$0xff]  ;;  %v1881_v25 = vld [vmem:[#allocation6 + $0x2a8] sm:$0xff] }
 0x3f2   : > { %v4509_v27 = vpack.c.bf16 %v1881_v25, %v1880_v24 }
 0x3f3   : > { %4324 = vmatpush3.bf16.msra.mxu1 %v5285_v28 }
 0x3f4   : > { %4326 = vmatprep.subr.bf16.mxu1 %v5289_v32  ;;  %4436 = vmatpush3.bf16.msra.mxu0 %v4433_v31  ;;  %v2003_v31 = vld [vmem:[#allocation6 + $0x3c0] sm:$0xff] }
 0x3f5   : > { %4534 = vmatprep.subr.bf16.mxu0 %v4533_v56  ;;  %v4549_v35 = vpack.c.bf16 %v2004_v34, %v2003_v31  ;;  %v1884_v34 = vld [vmem:[#allocation6 + $0x2c0] sm:$0xff] }
 0x3f7   : > { %4328 = vmatpush3.bf16.msra.mxu1 %v5289_v32  ;;  %3640 = vmatmul.mubr.f32.vlgmr.msra.gmra.mrb[4].mxu0 %v1581_v37  ;;  %v2670_v37 = vld [vmem:[%s5414_s2] ss:$0 sm:$0xff] }
 0x3f8   : > { %4330 = vmatprep.subr.bf16.mxu1 %v5293_v36  ;;  %4536 = vmatpush3.bf16.msra.mxu0 %v4533_v56  ;;  %v1879_v56 = vld [vmem:[#allocation6 + $0x298] sm:$0xff] }
 0x3f9   : > { %4538 = vmatprep.subr.bf16.mxu0 %v4537_v23  ;;  %v4505_v20 = vpack.c.bf16 %v1879_v56, %v1878_v18  ;;  %v2298_v18 = vld [vmem:[#allocation6 + $0x548] sm:$0xff] }
 0x3fb   : > { %4332 = vmatpush3.bf16.msra.mxu1 %v5293_v36 }
 0x3fc   : > { %4334 = vmatprep.subr.bf16.mxu1 %v5297_v42  ;;  %4540 = vmatpush3.bf16.msra.mxu0 %v4537_v23 }
 0x3fd   : > { %4542 = vmatprep.subr.bf16.mxu0 %v4541_v26 }
 0x3ff   : > { %4336 = vmatpush3.bf16.msra.mxu1 %v5297_v42 }
 0x400   : > { %4338 = vmatprep.subr.bf16.mxu1 %v5301_v48  ;;  %4544 = vmatpush3.bf16.msra.mxu0 %v4541_v26 }
 0x401   : > { %4546 = vmatprep.subr.bf16.mxu0 %v4545_v30 }
 0x403   : > { %4340 = vmatpush3.bf16.msra.mxu1 %v5301_v48 }
 0x404   : > { %4438 = vmatprep.subr.bf16.mxu1 %v4437_v52  ;;  %4548 = vmatpush3.bf16.msra.mxu0 %v4545_v30  ;;  %v1883_v30 = vld [vmem:[#allocation6 + $0x2b8] sm:$0xff] }
 0x405   : > { %4550 = vmatprep.subr.bf16.mxu0 %v4549_v35  ;;  %v4513_v31 = vpack.c.bf16 %v1883_v30, %v1882_v29 }
 0x406   : > { %3535 = vmatmul.mubr.f32.vlgmr.msra.gmra.mrb[2].mxu1 %v5244_v38  ;;  %v1720_v38 = vld [vmem:[#allocation6 + $0x260] sm:$0xff] }
 0x407   : > { %4440 = vmatpush3.bf16.msra.mxu1 %v4437_v52  ;;  %v4461_v3 = vpack.c.bf16 %v1721_v15, %v1720_v38  ;;  %v4485_v38 = vpack.c.bf16 %v1699_v61, %v1698_v60  ;;  %v1700_v15 = vld [vmem:[#allocation6 + $0x1d0] sm:$0xff]  ;;  %v2010_v61 = vld [vmem:[#allocation6 + $0x3f8] sm:$0xff] }
 0x408   : > { %4442 = vmatprep.subr.bf16.mxu1 %v4441_v58  ;;  %4552 = vmatpush3.bf16.msra.mxu0 %v4549_v35  ;;  %v1885_v35 = vld [vmem:[#allocation6 + $0x2c8] sm:$0xff]  ;;  %v2009_v60 = vld [vmem:[#allocation6 + $0x3f0] sm:$0xff] }
 0x40b   : > { %4444 = vmatpush3.bf16.msra.mxu1 %v4441_v58  ;;  %v1694_v58 = vld [vmem:[#allocation6 + $0x1a0] sm:$0xff] }
 0x40c   : > { %4446 = vmatprep.subr.bf16.mxu1 %v4445_v19  ;;  %v4477_v9 = vpack.c.bf16 %v1695_v4, %v1694_v58  ;;  %v2005_v4 = vld [vmem:[#allocation6 + $0x3d0] sm:$0xff] }
 0x40f   : > { %4448 = vmatpush3.bf16.msra.mxu1 %v4445_v19  ;;  %v1696_v19 = vld [vmem:[#allocation6 + $0x1b0] sm:$0xff] }
 0x410   : > { %4450 = vmatprep.subr.bf16.mxu1 %v4449_v39 }
 0x413   : > { %4452 = vmatpush3.bf16.msra.mxu1 %v4449_v39  ;;  %v4481_v39 = vpack.c.bf16 %v1697_v59, %v1696_v19  ;;  %v2007_v59 = vld [vmem:[#allocation6 + $0x3e0] sm:$0xff] }
 0x414   : > { %4454 = vmatprep.subr.bf16.mxu1 %v4453_v0 }
 0x417   : > { %4456 = vmatpush3.bf16.msra.mxu1 %v4453_v0 }
 0x418   : > { %4458 = vmatprep.subr.bf16.mxu1 %v4457_v13 }
 0x41b   : > { %4460 = vmatpush3.bf16.msra.mxu1 %v4457_v13 }
 0x41c   : > { %4462 = vmatprep.subr.bf16.mxu1 %v4461_v3 }
 0x41f   : > { %4464 = vmatpush3.bf16.msra.mxu1 %v4461_v3  ;;  %v1701_v3 = vld [vmem:[#allocation6 + $0x1d8] sm:$0xff] }
 0x420   : > { %4466 = vmatprep.subr.bf16.mxu1 %v4465_v8  ;;  %v4489_v49 = vpack.c.bf16 %v1701_v3, %v1700_v15  ;;  %v2290_v15 = vld [vmem:[#allocation6 + $0x508] sm:$0xff]  ;;  %v2291_v3 = vld [vmem:[#allocation6 + $0x510] sm:$0xff] }
 0x423   : > { %4468 = vmatpush3.bf16.msra.mxu1 %v4465_v8 }
 0x424   : > { %4470 = vmatprep.subr.bf16.mxu1 %v4469_v11 }
 0x4ca   : > { %v3641_v40 = vpop.f32.mrb[4].mxu0 }
 0x4cb   : > { %v1683_v41 = vadd.f32 %v3641_v40, %v2670_v37  ;;  %v1664_v44 = vpop.f32.mrb[5].mxu0  ;;  %v1886_v40 = vld [vmem:[#allocation6 + $0x2d0] sm:$0xff] }
 0x4cc   : > { %v1682_v46 = vadd.f32 %v2670_v37, %v1664_v44  ;;  %v4517_v37 = vpack.c.bf16 %v1885_v35, %v1884_v34  ;;  %v1981_v34 = vld [vmem:[#allocation6 + $0x320] sm:$0xff]  ;;  %v1982_v35 = vld [vmem:[#allocation6 + $0x328] sm:$0xff] }
 0x4cd   : > { %v1685_v52 = vmax.f32 %v1683_v41, 0.0  ;;  %v1887_v41 = vld [vmem:[#allocation6 + $0x2d8] sm:$0xff] }
 0x4ce   : > { %v1684_v55 = vmax.f32 %v1682_v46, 0.0  ;;  %v4521_v44 = vpack.c.bf16 %v1887_v41, %v1886_v40  ;;  %v1888_v46 = vld [vmem:[#allocation6 + $0x2e0] sm:$0xff] }
 0x4cf   : > { %1687 = vst [vmem:[#allocation2 + $0x9] sm:$0xff] %v1685_v52  ;;  %v4525_v51 = vpack.c.bf16 %v1889_v50, %v1888_v46  ;;  %v1986_v46 = vld [vmem:[#allocation6 + $0x348] sm:$0xff] }
 0x4d0   : > { %1686 = vst [vmem:[#allocation2 + $0x1] sm:$0xff] %v1684_v55  ;;  %3674 = vmatprep.mubr.f32.mxu1 %v1684_v55  ;;  %v1891_v55 = vld [vmem:[#allocation6 + $0x2f8] sm:$0xff] }
 0x4d1   : > { %3675 = vmatmul.mubr.f32.vlgmr.msra.gmra.mrb[4].mxu1 %v1685_v52  ;;  %v1890_v52 = vld [vmem:[#allocation6 + $0x2f0] sm:$0xff] }
 0x4d2   : > { %4472 = vmatpush3.bf16.msra.mxu1 %v4469_v11  ;;  %v1876_v11 = vld [vmem:[#allocation6 + $0x280] sm:$0xff] }
 0x4d3   : > { %4474 = vmatprep.subr.bf16.mxu1 %v4473_v57  ;;  %v4501_v17 = vpack.c.bf16 %v1877_v14, %v1876_v11  ;;  %v2296_v11 = vld [vmem:[#allocation6 + $0x538] sm:$0xff] }
 0x4d6   : > { %4476 = vmatpush3.bf16.msra.mxu1 %v4473_v57  ;;  %v4529_v57 = vpack.c.bf16 %v1891_v55, %v1890_v52  ;;  %v1875_v58 = vld [vmem:[#allocation2 + $0xa] sm:$0xff] }
 0x4d7   : > { %v1688_v22 = vld [vmem:[#allocation2] sm:$0xff]  ;;  %4478 = vmatprep.subr.bf16.mxu1 %v4477_v9  ;;  %v1689_v23 = vld [vmem:[#allocation2 + $0x8] sm:$0xff]  ;;  %v1988_v52 = vld [vmem:[#allocation6 + $0x358] sm:$0xff] }
 0x4d8   : > { %3709 = vmatprep.mubr.f32.mxu1 %v1688_v22  ;;  %v1874_v26 = vld [vmem:[#allocation2 + $0x2] sm:$0xff] }
 0x4d9   : > { %v3536_v0 = vpop.f32.mrb[2].mxu1  ;;  %v2008_v22 = vld [vmem:[#allocation6 + $0x3e8] sm:$0xff] }
 0x4da   : > { %v1384_v1 = vadd.f32 %v3536_v0, %v5201_v62  ;;  %v1372_v2 = vpop.f32.mrb[3].mxu1  ;;  %4480 = vmatpush3.bf16.msra.mxu1 %v4477_v9  ;;  %v1703_v62 = vld [vmem:[#allocation6 + $0x1e8] sm:$0xff]  ;;  %v2006_v9 = vld [vmem:[#allocation6 + $0x3d8] sm:$0xff]  ;;  %v4561_v0 = vpack.c.bf16 %v2010_v61, %v2009_v60  ;;  %v2165_v61 = vld [vmem:[#allocation6 + $0x410] sm:$0xff] }
 0x4db   : > { %v1383_v13 = vadd.f32 %v1372_v2, %v5203_v63  ;;  %4482 = vmatprep.subr.bf16.mxu1 %v4481_v39  ;;  %v4493_v8 = vpack.c.bf16 %v1703_v62, %v1702_v7  ;;  %v1704_v63 = vld [vmem:[#allocation6 + $0x1f0] sm:$0xff]  ;;  %v4553_v19 = vpack.c.bf16 %v2006_v9, %v2005_v4  ;;  %v1978_v2 = vld [vmem:[#allocation6 + $0x308] sm:$0xff]  ;;  %v2292_v7 = vld [vmem:[#allocation6 + $0x518] sm:$0xff] }
 0x4dc   : > { %1386 = vst [vmem:[%s5314_s5 + $0x8] sm:$0xff] %v1384_v1  ;;  %v4497_v10 = vpack.c.bf16 %v1705_v53, %v1704_v63  ;;  %v1977_v1 = vld [vmem:[#allocation6 + $0x300] sm:$0xff]  ;;  %v4633_v62 = vpack.c.bf16 %v2292_v7, %v2291_v3  ;;  %v2294_v63 = vld [vmem:[#allocation6 + $0x528] sm:$0xff]  ;;  %v1991_v9 = vld [vmem:[#allocation6 + $0x370] sm:$0xff] }
 0x4dd   : > { %1385 = vst [vmem:[%s5314_s5] sm:$0xff] %v1383_v13  ;;  %4554 = vmatprep.subr.bf16.mxu0 %v4553_v19  ;;  %v4565_v13 = vpack.c.bf16 %v1978_v2, %v1977_v1  ;;  %v2170_v7 = vld [vmem:[#allocation6 + $0x438] sm:$0xff] }
 0x4de   : > { %4484 = vmatpush3.bf16.msra.mxu1 %v4481_v39  ;;  %4556 = vmatpush3.bf16.msra.mxu0 %v4553_v19  ;;  %v4557_v39 = vpack.c.bf16 %v2008_v22, %v2007_v59  ;;  %v1992_v19 = vld [vmem:[#allocation6 + $0x378] sm:$0xff]  ;;  %v2163_v22 = vld [vmem:[#allocation6 + $0x400] sm:$0xff] }
 0x4df   : > { %4486 = vmatprep.subr.bf16.mxu1 %v4485_v38  ;;  %v4593_v59 = vpack.c.bf16 %v1992_v19, %v1991_v9 }
 0x4e0   : > { %4558 = vmatprep.subr.bf16.mxu0 %v4557_v39 }
 0x4e2   : > { %4488 = vmatpush3.bf16.msra.mxu1 %v4485_v38  ;;  %4560 = vmatpush3.bf16.msra.mxu0 %v4557_v39  ;;  %v2289_v38 = vld [vmem:[#allocation6 + $0x500] sm:$0xff]  ;;  %v2164_v39 = vld [vmem:[#allocation6 + $0x408] sm:$0xff] }
 0x4e3   : > { %4490 = vmatprep.subr.bf16.mxu1 %v4489_v49  ;;  %4562 = vmatprep.subr.bf16.mxu0 %v4561_v0  ;;  %v4597_v60 = vpack.c.bf16 %v2164_v39, %v2163_v22  ;;  %v2275_v22 = vld [vmem:[#allocation6 + $0x4a0] sm:$0xff]  ;;  %v2276_v39 = vld [vmem:[#allocation6 + $0x4a8] sm:$0xff] }
 0x4e6   : > { %4492 = vmatpush3.bf16.msra.mxu1 %v4489_v49  ;;  %4564 = vmatpush3.bf16.msra.mxu0 %v4561_v0  ;;  %v4629_v49 = vpack.c.bf16 %v2290_v15, %v2289_v38  ;;  %v2166_v0 = vld [vmem:[#allocation6 + $0x418] sm:$0xff]  ;;  %v2168_v38 = vld [vmem:[#allocation6 + $0x428] sm:$0xff] }
 0x4e7   : > { %4494 = vmatprep.subr.bf16.mxu1 %v4493_v8  ;;  %4566 = vmatprep.subr.bf16.mxu0 %v4565_v13  ;;  %v4601_v1 = vpack.c.bf16 %v2166_v0, %v2165_v61 }
 0x4ea   : > { %4496 = vmatpush3.bf16.msra.mxu1 %v4493_v8  ;;  %v2293_v8 = vld [vmem:[#allocation6 + $0x520] sm:$0xff] }
 0x4eb   : > { %4498 = vmatprep.subr.bf16.mxu1 %v4497_v10  ;;  %v4637_v53 = vpack.c.bf16 %v2294_v63, %v2293_v8  ;;  %v2171_v8 = vld [vmem:[#allocation6 + $0x440] sm:$0xff]  ;;  %v2172_v63 = vld [vmem:[#allocation6 + $0x448] sm:$0xff] }
 0x4ee   : > { %4500 = vmatpush3.bf16.msra.mxu1 %v4497_v10  ;;  %v2295_v10 = vld [vmem:[#allocation6 + $0x530] sm:$0xff] }
 0x4ef   : > { %4502 = vmatprep.subr.bf16.mxu1 %v4501_v17  ;;  %v4641_v14 = vpack.c.bf16 %v2296_v11, %v2295_v10  ;;  %v2173_v10 = vld [vmem:[#allocation6 + $0x450] sm:$0xff]  ;;  %v2174_v11 = vld [vmem:[#allocation6 + $0x458] sm:$0xff] }
 0x4f1   : > { %3710 = vmatmul.mubr.f32.vlgmr.msra.gmra.mrb[4].mxu1 %v1689_v23 }
 0x4f2   : > { %4504 = vmatpush3.bf16.msra.mxu1 %v4501_v17  ;;  %3744 = vmatprep.mubr.f32.mxu1 %v1874_v26  ;;  %v2297_v17 = vld [vmem:[#allocation6 + $0x540] sm:$0xff]  ;;  %v1979_v26 = vld [vmem:[#allocation6 + $0x310] sm:$0xff] }
 0x4f3   : > { %4506 = vmatprep.subr.bf16.mxu1 %v4505_v20  ;;  %v4645_v56 = vpack.c.bf16 %v2298_v18, %v2297_v17  ;;  %v2175_v17 = vld [vmem:[#allocation6 + $0x460] sm:$0xff]  ;;  %v2176_v18 = vld [vmem:[#allocation6 + $0x468] sm:$0xff] }
 0x4f6   : > { %4508 = vmatpush3.bf16.msra.mxu1 %v4505_v20 }
 0x4f7   : > { %4510 = vmatprep.subr.bf16.mxu1 %v4509_v27 }
 0x4fa   : > { %4512 = vmatpush3.bf16.msra.mxu1 %v4509_v27  ;;  %v1980_v27 = vld [vmem:[#allocation6 + $0x318] sm:$0xff] }
 0x4fb   : > { %4514 = vmatprep.subr.bf16.mxu1 %v4513_v31 }
 0x4fe   : > { %4516 = vmatpush3.bf16.msra.mxu1 %v4513_v31  ;;  %v4569_v31 = vpack.c.bf16 %v1980_v27, %v1979_v26  ;;  %v2299_v26 = vld [vmem:[#allocation6 + $0x550] sm:$0xff]  ;;  %v2300_v27 = vld [vmem:[#allocation6 + $0x558] sm:$0xff] }
 0x4ff   : > { %4518 = vmatprep.subr.bf16.mxu1 %v4517_v37 }
 0x502   : > { %4520 = vmatpush3.bf16.msra.mxu1 %v4517_v37  ;;  %v1984_v37 = vld [vmem:[#allocation6 + $0x338] sm:$0xff] }
 0x503   : > { %4522 = vmatprep.subr.bf16.mxu1 %v4521_v44 }
 0x506   : > { %4524 = vmatpush3.bf16.msra.mxu1 %v4521_v44  ;;  %v1985_v44 = vld [vmem:[#allocation6 + $0x340] sm:$0xff] }
 0x507   : > { %4526 = vmatprep.subr.bf16.mxu1 %v4525_v51  ;;  %v4581_v50 = vpack.c.bf16 %v1986_v46, %v1985_v44  ;;  %v2272_v44 = vld [vmem:[#allocation6 + $0x488] sm:$0xff] }
 0x50a   : > { %4528 = vmatpush3.bf16.msra.mxu1 %v4525_v51  ;;  %v1987_v51 = vld [vmem:[#allocation6 + $0x350] sm:$0xff] }
 0x50b   : > { %4530 = vmatprep.subr.bf16.mxu1 %v4529_v57  ;;  %v4585_v55 = vpack.c.bf16 %v1988_v52, %v1987_v51 }
 0x50e   : > { %4532 = vmatpush3.bf16.msra.mxu1 %v4529_v57  ;;  %v1989_v57 = vld [vmem:[#allocation6 + $0x360] sm:$0xff] }
 0x50f   : > { %4630 = vmatprep.subr.bf16.mxu1 %v4629_v49 }
 0x511   : > { %3745 = vmatmul.mubr.f32.vlgmr.msra.gmra.mrb[4].mxu1 %v1875_v58  ;;  %v1990_v58 = vld [vmem:[#allocation6 + $0x368] sm:$0xff] }
 0x512   : > { %4632 = vmatpush3.bf16.msra.mxu1 %v4629_v49  ;;  %v4589_v4 = vpack.c.bf16 %v1990_v58, %v1989_v57  ;;  %v2169_v49 = vld [vmem:[#allocation6 + $0x430] sm:$0xff] }
 0x513   : > { %4634 = vmatprep.subr.bf16.mxu1 %v4633_v62  ;;  %v2273_v58 = vld [vmem:[#allocation6 + $0x490] sm:$0xff] }
 0x516   : > { %4636 = vmatpush3.bf16.msra.mxu1 %v4633_v62  ;;  %v4609_v62 = vpack.c.bf16 %v2170_v7, %v2169_v49 }
 0x517   : > { %4638 = vmatprep.subr.bf16.mxu1 %v4637_v53 }
 0x51a   : > { %4640 = vmatpush3.bf16.msra.mxu1 %v4637_v53  ;;  %v4613_v53 = vpack.c.bf16 %v2172_v63, %v2171_v8 }
 0x51b   : > { %4642 = vmatprep.subr.bf16.mxu1 %v4641_v14 }
 0x51e   : > { %4644 = vmatpush3.bf16.msra.mxu1 %v4641_v14  ;;  %v4617_v14 = vpack.c.bf16 %v2174_v11, %v2173_v10 }
 0x51f   : > { %4646 = vmatprep.subr.bf16.mxu1 %v4645_v56 }
 0x522   : > { %4648 = vmatpush3.bf16.msra.mxu1 %v4645_v56  ;;  %v4621_v56 = vpack.c.bf16 %v2176_v18, %v2175_v17 }
 0x5e4   : > { %v3746_v20 = vpop.f32.mrb[4].mxu1 }
 0x5e5   : > { %v1970_v23 = vadd.f32 %v3746_v20, %v5230_v16  ;;  %v1958_v24 = vpop.f32.mrb[5].mxu1  ;;  %v1983_v16 = vld [vmem:[#allocation6 + $0x330] sm:$0xff] }
 0x5e6   : > { %v1969_v25 = vadd.f32 %v1958_v24, %v5227_v6  ;;  %v4573_v6 = vpack.c.bf16 %v1982_v35, %v1981_v34  ;;  %v4577_v41 = vpack.c.bf16 %v1984_v37, %v1983_v16  ;;  %v2177_v20 = vld [vmem:[#allocation6 + $0x470] sm:$0xff]  ;;  %v2301_v34 = vld [vmem:[#allocation6 + $0x560] sm:$0xff]  ;;  %v2302_v35 = vld [vmem:[#allocation6 + $0x568] sm:$0xff] }
 0x5e7   : > { %v5320_v29 = vmax.f32 %v1970_v23, 0.0  ;;  %v2178_v23 = vld [vmem:[#allocation6 + $0x478] sm:$0xff]  ;;  %v2303_v16 = vld [vmem:[#allocation6 + $0x570] sm:$0xff] }
 0x5e8   : > { %v5322_v30 = vmax.f32 %v1969_v25, 0.0  ;;  %v4625_v24 = vpack.c.bf16 %v2178_v23, %v2177_v20  ;;  %v2304_v37 = vld [vmem:[#allocation6 + $0x578] sm:$0xff] }
 0x5e9   : > { %1974 = vst [vmem:[#allocation2 + $0x9] sm:$0xff] %v5320_v29 }
 0x5ea   : > { %1973 = vst [vmem:[#allocation2 + $0x1] sm:$0xff] %v5322_v30  ;;  %3779 = vmatprep.mubr.f32.mxu0 %v5322_v30 }
 0x5eb   : > { %3780 = vmatmul.mubr.f32.vlgmr.msra.gmra.mrb[6].mxu0 %v5320_v29 }
 0x5ec   : > { %4568 = vmatpush3.bf16.msra.mxu0 %v4565_v13  ;;  %v2167_v13 = vld [vmem:[#allocation6 + $0x420] sm:$0xff] }
 0x5ed   : > { %4570 = vmatprep.subr.bf16.mxu0 %v4569_v31  ;;  %v4605_v3 = vpack.c.bf16 %v2168_v38, %v2167_v13 }
 0x5f0   : > { %4572 = vmatpush3.bf16.msra.mxu0 %v4569_v31  ;;  %v2162_v25 = vld [vmem:[#allocation2 + $0xa] sm:$0xff]  ;;  %v4649_v31 = vpack.c.bf16 %v2300_v27, %v2299_v26 }
 0x5f1   : > { %v1975_v40 = vld [vmem:[#allocation2] sm:$0xff]  ;;  %4574 = vmatprep.subr.bf16.mxu0 %v4573_v6  ;;  %v1976_v2 = vld [vmem:[#allocation2 + $0x8] sm:$0xff] }
 0x5f2   : > { %3814 = vmatprep.mubr.f32.mxu0 %v1975_v40  ;;  %v2161_v15 = vld [vmem:[#allocation2 + $0x2] sm:$0xff]  ;;  %4650 = vmatprep.subr.bf16.mxu1 %v4649_v31  ;;  %v4657_v40 = vpack.c.bf16 %v2304_v37, %v2303_v16 }
 0x5f3   : > { %4652 = vmatpush3.bf16.msra.mxu1 %v4649_v31 }
 0x5f4   : > { %4576 = vmatpush3.bf16.msra.mxu0 %v4573_v6  ;;  %v4653_v6 = vpack.c.bf16 %v2302_v35, %v2301_v34 }
 0x5f5   : > { %4578 = vmatprep.subr.bf16.mxu0 %v4577_v41 }
 0x5f6   : > { %4654 = vmatprep.subr.bf16.mxu1 %v4653_v6 }
 0x5f7   : > { %4656 = vmatpush3.bf16.msra.mxu1 %v4653_v6 }
 0x5f8   : > { %4580 = vmatpush3.bf16.msra.mxu0 %v4577_v41  ;;  %4658 = vmatprep.subr.bf16.mxu1 %v4657_v40  ;;  %v2271_v41 = vld [vmem:[#allocation6 + $0x480] sm:$0xff] }
 0x5f9   : > { %4582 = vmatprep.subr.bf16.mxu0 %v4581_v50  ;;  %v4661_v46 = vpack.c.bf16 %v2272_v44, %v2271_v41 }
 0x5fb   : > { %4660 = vmatpush3.bf16.msra.mxu1 %v4657_v40 }
 0x5fc   : > { %4584 = vmatpush3.bf16.msra.mxu0 %v4581_v50  ;;  %4662 = vmatprep.subr.bf16.mxu1 %v4661_v46  ;;  %v2672_v50 = vld [vmem:[%s5414_s2 + $0x1] ss:$0 sm:$0xff] }
 0x5fd   : > { %4586 = vmatprep.subr.bf16.mxu0 %v4585_v55 }
 0x600   : > { %4588 = vmatpush3.bf16.msra.mxu0 %v4585_v55 }
 0x601   : > { %4590 = vmatprep.subr.bf16.mxu0 %v4589_v4 }
 0x604   : > { %4592 = vmatpush3.bf16.msra.mxu0 %v4589_v4  ;;  %v2274_v4 = vld [vmem:[#allocation6 + $0x498] sm:$0xff] }
 0x605   : > { %4594 = vmatprep.subr.bf16.mxu0 %v4593_v59 }
 0x608   : > { %4596 = vmatpush3.bf16.msra.mxu0 %v4593_v59  ;;  %v4665_v59 = vpack.c.bf16 %v2274_v4, %v2273_v58 }
 0x609   : > { %4598 = vmatprep.subr.bf16.mxu0 %v4597_v60 }
 0x60b   : > { %3815 = vmatmul.mubr.f32.vlgmr.msra.gmra.mrb[6].mxu0 %v1976_v2 }
 0x60c   : > { %4600 = vmatpush3.bf16.msra.mxu0 %v4597_v60  ;;  %3849 = vmatprep.mubr.f32.mxu0 %v2161_v15  ;;  %v4669_v60 = vpack.c.bf16 %v2276_v39, %v2275_v22 }
 0x60d   : > { %4602 = vmatprep.subr.bf16.mxu0 %v4601_v1 }
 0x610   : > { %4604 = vmatpush3.bf16.msra.mxu0 %v4601_v1 }
 0x611   : > { %4606 = vmatprep.subr.bf16.mxu0 %v4605_v3 }
 0x614   : > { %4608 = vmatpush3.bf16.msra.mxu0 %v4605_v3 }
 0x615   : > { %4610 = vmatprep.subr.bf16.mxu0 %v4609_v62 }
 0x618   : > { %4612 = vmatpush3.bf16.msra.mxu0 %v4609_v62 }
 0x619   : > { %4614 = vmatprep.subr.bf16.mxu0 %v4613_v53 }
 0x61c   : > { %4616 = vmatpush3.bf16.msra.mxu0 %v4613_v53 }
 0x61d   : > { %4618 = vmatprep.subr.bf16.mxu0 %v4617_v14 }
 0x620   : > { %4620 = vmatpush3.bf16.msra.mxu0 %v4617_v14 }
 0x621   : > { %4622 = vmatprep.subr.bf16.mxu0 %v4621_v56 }
 0x624   : > { %4624 = vmatpush3.bf16.msra.mxu0 %v4621_v56 }
 0x625   : > { %4626 = vmatprep.subr.bf16.mxu0 %v4625_v24 }
 0x628   : > { %4628 = vmatpush3.bf16.msra.mxu0 %v4625_v24 }
 0x62b   : > { %3850 = vmatmul.mubr.f32.vlgmr.msra.gmra.mrb[6].mxu0 %v2162_v25 }
 0x6fe   : > { %v3851_v51 = vpop.f32.mrb[6].mxu0 }
 0x6ff   : > { %v2264_v52 = vadd.f32 %v3851_v51, %v2672_v50  ;;  %v2245_v55 = vpop.f32.mrb[7].mxu0 }
 0x700   : > { %v2263_v57 = vadd.f32 %v2672_v50, %v2245_v55 }
 0x701   : > { %v2266_v9 = vmax.f32 %v2264_v52, 0.0 }
 0x702   : > { %v2265_v19 = vmax.f32 %v2263_v57, 0.0 }
 0x703   : > { %2268 = vst [vmem:[#allocation2 + $0x9] sm:$0xff] %v2266_v9 }
 0x704   : > { %2267 = vst [vmem:[#allocation2 + $0x1] sm:$0xff] %v2265_v19  ;;  %3884 = vmatprep.mubr.f32.mxu1 %v2265_v19 }
 0x705   : > { %3885 = vmatmul.mubr.f32.vlgmr.msra.gmra.mrb[6].mxu1 %v2266_v9 }
 0x706   : > { %4664 = vmatpush3.bf16.msra.mxu1 %v4661_v46 }
 0x707   : > { %4666 = vmatprep.subr.bf16.mxu1 %v4665_v59 }
 0x70a   : > { %4668 = vmatpush3.bf16.msra.mxu1 %v4665_v59 }
 0x70b   : > { %v2269_v61 = vld [vmem:[#allocation2] sm:$0xff]  ;;  %4670 = vmatprep.subr.bf16.mxu1 %v4669_v60  ;;  %v2270_v0 = vld [vmem:[#allocation2 + $0x8] sm:$0xff] }
 0x70c   : > { %3919 = vmatprep.mubr.f32.mxu1 %v2269_v61 }
 0x70e   : > { %4672 = vmatpush3.bf16.msra.mxu1 %v4669_v60 }
 0x70f   : > { %4674 = vmatprep.subr.bf16.mxu1 %v5250_v43 }
 0x712   : > { %4676 = vmatpush3.bf16.msra.mxu1 %v5250_v43  ;;  %v2455_v43 = vld [vmem:[#allocation2 + $0x2] sm:$0xff] }
 0x713   : > { %4678 = vmatprep.subr.bf16.mxu1 %v5255_v47 }
 0x716   : > { %4680 = vmatpush3.bf16.msra.mxu1 %v5255_v47  ;;  %v2456_v47 = vld [vmem:[#allocation2 + $0xa] sm:$0xff] }
 0x717   : > { %4682 = vmatprep.subr.bf16.mxu1 %v5259_v54 }
 0x71a   : > { %4684 = vmatpush3.bf16.msra.mxu1 %v5259_v54 }
 0x71b   : > { %4686 = vmatprep.subr.bf16.mxu1 %v5263_v33 }
 0x71e   : > { %4688 = vmatpush3.bf16.msra.mxu1 %v5263_v33 }
 0x71f   : > { %4690 = vmatprep.subr.bf16.mxu1 %v5267_v45 }
 0x722   : > { %4692 = vmatpush3.bf16.msra.mxu1 %v5267_v45 }
 0x723   : > { %4694 = vmatprep.subr.bf16.mxu1 %v5271_v5 }
 0x725   : > { %3920 = vmatmul.mubr.f32.vlgmr.msra.gmra.mrb[6].mxu1 %v2270_v0 }
 0x726   : > { %4696 = vmatpush3.bf16.msra.mxu1 %v5271_v5  ;;  %3954 = vmatprep.mubr.f32.mxu1 %v2455_v43 }
 0x727   : > { %4698 = vmatprep.subr.bf16.mxu1 %v5275_v12 }
 0x72a   : > { %4700 = vmatpush3.bf16.msra.mxu1 %v5275_v12 }
 0x72b   : > { %4702 = vmatprep.subr.bf16.mxu1 %v5281_v21 }
 0x72e   : > { %4704 = vmatpush3.bf16.msra.mxu1 %v5281_v21 }
 0x72f   : > { %4706 = vmatprep.subr.bf16.mxu1 %v5285_v28 }
 0x732   : > { %4708 = vmatpush3.bf16.msra.mxu1 %v5285_v28 }
 0x733   : > { %4710 = vmatprep.subr.bf16.mxu1 %v5289_v32 }
 0x736   : > { %4712 = vmatpush3.bf16.msra.mxu1 %v5289_v32 }
 0x737   : > { %4714 = vmatprep.subr.bf16.mxu1 %v5293_v36 }
 0x73a   : > { %4716 = vmatpush3.bf16.msra.mxu1 %v5293_v36 }
 0x73b   : > { %4718 = vmatprep.subr.bf16.mxu1 %v5297_v42 }
 0x73e   : > { %4720 = vmatpush3.bf16.msra.mxu1 %v5297_v42 }
 0x73f   : > { %4722 = vmatprep.subr.bf16.mxu1 %v5301_v48 }
 0x742   : > { %4724 = vmatpush3.bf16.msra.mxu1 %v5301_v48 }
 0x745   : > { %3955 = vmatmul.mubr.f32.vlgmr.msra.gmra.mrb[6].mxu1 %v2456_v47 }
 0x818   : > { %v3956_v54 = vpop.f32.mrb[6].mxu1 }
 0x819   : > { %v2551_v33 = vadd.f32 %v3956_v54, %v5320_v29  ;;  %v2539_v45 = vpop.f32.mrb[7].mxu1 }
 0x81a   : > { %v2550_v5 = vadd.f32 %v2539_v45, %v5322_v30 }
 0x81b   : > { %2674 = vst [vmem:[%s5314_s5 + $0x18] sm:$0xff] %v2551_v33 }
 0x81c   : > { %2673 = vst [vmem:[%s5314_s5 + $0x10] sm:$0xff] %v2550_v5 }
 0x81d   : > { %4890 = shalt.err (!%p4887_p7)
}
 0x81e   : > { %s4891_s20 = scalar_lea.hbm %s5365_s22, 512  ;;  %s4895_s4 = scalar_lea.hbm %s5415_s3, 1024 }
 0x81f   : > { %p4892_p9 = scmp.ne.s32.totalorder %s5365_s22, %s4891_s20  ;;  %p4896_p5 = scmp.lt.u32.totalorder %s5365_s22, %s5415_s3 }
 0x820   : > { %p4897_p11 = scmp.lt.u32.totalorder %s4895_s4, %s4891_s20  ;;  %p4899_p4 = scmp.lt.u32.totalorder %s4891_s20, %s5365_s22 }
 0x821   : > { %p4893_p1 = pnand %p4892_p9, %p5071_p12 }
 0x822   : > { %p4898_p2 = por %p4897_p11, %p4896_p5 }
 0x823   : > { %p4894_p0 = pneg %p4893_p1 }
 0x824   : > { %p4900_p6 = por %p4899_p4, %p4898_p2 }
 0x826   : > { %p4901_p8 = pnand %p4900_p6, %p4894_p0 }
 0x828   : > { %4904 = shalt.err (!%p4901_p8)
}
 0x829   : > { %s4955_s11 = smov 128   ;;  %s4956_s27 = smov 8  }
 0x82a   : > { %4763 = dma.vmem_to_hbm [thread:$0]  (%p5071_p12), %s5359_s28, 512, %s5365_s22, %s2556_s7, %s4955_s11, %s4955_s11, %s4956_s27  }
 0x82b PF: > { %s2585_s23 = sand.u32 1, %s4935_s12   ;;  %p5430_p10 = scmp.ne.s32.totalorder %s5420_s19, 0 }
 0x82c   : > { %p5431_p13 = scmp.ge.s32.totalorder %s4947_s15, 2  ;;  %s2586_s29 = scalar_lea.sflag [#allocation5], %s2585_s23 }
 0x82e   : > { %p4774_p3 = pnand %p5431_p13, %p5430_p10 }
 0x830   : > { %4930 = dma.done.wait (!%p4774_p3), %s2586_s29, 512  }
 0x831   : > { %4932 = vsyncadd (!%p4774_p3), %s2586_s29, 4294966784  ;;  %p17_p7 = scmp.ge.s32.totalorder %s5033_s24, 4   ;;  %s5432_s12 = smov %s4939_s13 }
 0x832   : > { %s5433_s13 = smov %s4943_s14  ;;  %s5434_s14 = smov %s5067_s17 }
 0x833   : > { %s5435_s15 = smov %s5033_s24  ;;  %19 = sbr.rel (!%p17_p7) target bundleno = 6 (0x6), region = 95 }
 0x83a   :  { %2591 = vsyncpa [#allocation4], 1 }
 0x83b   :  { %2593 = vsyncpa [#allocation4 + $0x1], 1 }
 0x83c   :  { %2594 = vsyncpa [#allocation7], 1 }
 0x83d   :  { %2595 = vsyncpa [#allocation5], 1 }
 0x83e   :  { %2597 = vsyncpa [#allocation5 + $0x1], 1 }

</bundles_post_ra>
